<compile_context>
chip_gen: v7x
topology: tpu7x:2x2x1
jax: 0.10.0
libtpu: 0.0.40
codegen_flags: <defaults>
</compile_context>

<pallas_src>
import functools

import jax
import jax.numpy as jnp
from jax import lax
from jax.experimental import pallas as pl
from jax.experimental.pallas import tpu as pltpu

_VMEM_LIMIT = 32 * 1024 * 1024


# ---------------------------------------------------------------------------
# Pallas kernel 1: lane-dense fused matmul
#   o(Cout, TM) = act( Wt(Cout, K) @ Xt(K, TM) + b(Cout, 1) )
#   bf16 inputs, f32 MXU accumulation, f32 bias/activation, bf16 (or f32) store.
#   The pixel axis M sits on the 128-lane axis of the OUTPUT, so stores are
#   dense even when Cout is small (4 / 16 / 32 / 64).
# ---------------------------------------------------------------------------
def _wtx_bias_act_kernel(wt_ref, xt_ref, b_ref, o_ref, *, act):
    acc = jnp.dot(wt_ref[...], xt_ref[...], preferred_element_type=jnp.float32)
    acc = acc + b_ref[...]                       # (Cout, 1) broadcasts over lanes
    if act == "relu":
        acc = jnp.maximum(acc, 0.0)
    elif act == "tanh":
        acc = jnp.tanh(acc)
    o_ref[...] = acc.astype(o_ref.dtype)


def matmul_T_bias_act(wt, xt, b2d, act, out_dtype=jnp.bfloat16):
    """wt: (Cout, K) bf16, xt: (K, M) bf16, b2d: (Cout, 1) f32 -> (Cout, M)."""
    Cout, K = wt.shape
    K2, M = xt.shape
    assert K == K2
    TM = M if M <= 512 else 512                  # full-extent or 128-aligned tile
    grid = pl.cdiv(M, TM)
    return pl.pallas_call(
        functools.partial(_wtx_bias_act_kernel, act=act),
        out_shape=jax.ShapeDtypeStruct((Cout, M), out_dtype),
        grid_spec=pltpu.PrefetchScalarGridSpec(
            num_scalar_prefetch=0,
            grid=(grid,),
            in_specs=[
                pl.BlockSpec((Cout, K), lambda i: (0, 0)),   # weight: VMEM-resident
                pl.BlockSpec((K, TM), lambda i: (0, i)),
                pl.BlockSpec((Cout, 1), lambda i: (0, 0)),
            ],
            out_specs=pl.BlockSpec((Cout, TM), lambda i: (0, i)),
        ),
        compiler_params=pltpu.CompilerParams(
            dimension_semantics=("parallel",),
            vmem_limit_bytes=_VMEM_LIMIT),
    )(wt, xt, b2d)


# ---------------------------------------------------------------------------
# Pallas kernel 2: fused e3 (Conv2d 32->64, 7x7 valid) + d1 (ConvTranspose2d
# 64->32, 7x7) — both are plain dense matmuls on the 1x1-spatial latent.
# Tiled over batch; the 64-wide latent h stays in VMEM in f32.
# ---------------------------------------------------------------------------
def _latent_kernel(x_ref, w1_ref, b1_ref, w2_ref, b2_ref, o_ref):
    h = jnp.dot(x_ref[...], w1_ref[...], preferred_element_type=jnp.float32)
    h = h + b1_ref[...]                          # encoder's last conv: no activation
    y = jnp.dot(h, w2_ref[...], preferred_element_type=jnp.float32)  # f32 x f32
    y = jnp.maximum(y + b2_ref[...], 0.0)        # decoder d1 ReLU
    o_ref[...] = y.astype(o_ref.dtype)


def latent_fused(x, w1, b1, w2, b2):
    """x: (N, K1) bf16, w1: (K1, C1) bf16, w2: (C1, C2) f32 -> (N, C2) bf16."""
    N, K1 = x.shape
    _, C1 = w1.shape
    _, C2 = w2.shape
    TN = N if N <= 256 else 256
    grid = pl.cdiv(N, TN)
    return pl.pallas_call(
        _latent_kernel,
        out_shape=jax.ShapeDtypeStruct((N, C2), jnp.bfloat16),
        grid_spec=pltpu.PrefetchScalarGridSpec(
            num_scalar_prefetch=0,
            grid=(grid,),
            in_specs=[
                pl.BlockSpec((TN, K1), lambda i: (i, 0)),
                pl.BlockSpec((K1, C1), lambda i: (0, 0)),
                pl.BlockSpec((1, C1), lambda i: (0, 0)),
                pl.BlockSpec((C1, C2), lambda i: (0, 0)),
                pl.BlockSpec((1, C2), lambda i: (0, 0)),
            ],
            out_specs=pl.BlockSpec((TN, C2), lambda i: (i, 0)),
        ),
        compiler_params=pltpu.CompilerParams(
            dimension_semantics=("parallel",),
            vmem_limit_bytes=_VMEM_LIMIT),
    )(x, w1, b1, w2, b2)


# ---------------------------------------------------------------------------
# Host-side glue (XLA): tap gathers / reshapes only, all in channel-major
# (C, N, H, W) layout and bf16 so no transposes back to NHWC between layers.
# ---------------------------------------------------------------------------
def _im2col_T_cm(x, KH, KW, stride):
    """x: (C, N, H, W) already padded.  Returns (KH*KW*C, N*Ho*Wo), Ho, Wo.
    Rows ordered (kh, kw, c); columns ordered (n, ho, wo)."""
    C, N, H, W = x.shape
    Ho = (H - KH) // stride + 1
    Wo = (W - KW) // stride + 1
    taps = []
    for kh in range(KH):
        for kw in range(KW):
            taps.append(lax.slice(
                x, (0, 0, kh, kw),
                (C, N, kh + (Ho - 1) * stride + 1, kw + (Wo - 1) * stride + 1),
                (1, 1, stride, stride)))
    p = jnp.stack(taps, axis=0)                  # (T, C, N, Ho, Wo)
    return p.reshape(KH * KW * C, N * Ho * Wo), Ho, Wo


def conv2d_cm(x, wt, b2d, ksize, stride, pad, act, out_dtype=jnp.bfloat16):
    """x: (Cin, N, H, W) bf16; wt: (Cout, ksize*ksize*Cin) pre-packed bf16."""
    Cout = wt.shape[0]
    N = x.shape[1]
    xp = jnp.pad(x, ((0, 0), (0, 0), (pad, pad), (pad, pad)))
    xt, Ho, Wo = _im2col_T_cm(xp, ksize, ksize, stride)
    out = matmul_T_bias_act(wt, xt, b2d, act, out_dtype)
    return out.reshape(Cout, N, Ho, Wo)          # free reshape, stays channel-major


def conv_transpose2d_s2_cm(x, wt, b2d, act, out_dtype=jnp.bfloat16):
    """ConvTranspose2d(Cin, Cout, 3, stride=2, padding=1, output_padding=1)
    via the sub-pixel decomposition.  x: (Cin, N, H, W) bf16,
    wt: (4*Cout, 4*Cin) pre-packed parity weight (rows (dr, dc, cout))."""
    Cin, N, H, W = x.shape
    Cout = wt.shape[0] // 4
    # 2x2 tap gather of the (high-side zero padded) UNDILATED input.
    xp = jnp.pad(x, ((0, 0), (0, 0), (0, 1), (0, 1)))
    taps = [xp[:, :, tr:tr + H, tc:tc + W] for tr in (0, 1) for tc in (0, 1)]
    xt = jnp.stack(taps, axis=0).reshape(4 * Cin, N * H * W)
    out = matmul_T_bias_act(wt, xt, b2d, act, out_dtype)
    # (4*Cout, N*H*W) rows (dr, dc, cout) -> interleave parities -> (Cout, N, 2H, 2W)
    out = out.reshape(2, 2, Cout, N, H, W)
    out = jnp.transpose(out, (2, 3, 4, 0, 5, 1))     # (Cout, N, H, dr, W, dc)
    return out.reshape(Cout, N, 2 * H, 2 * W)


# ---------------------------------------------------------------------------
# Parameter init (PyTorch-layout weights) + one-time kernel-ready packing
# ---------------------------------------------------------------------------
def init_params(key, input_size):
    def _uniform(k, shape, fan_in):
        bound = 1.0 / float(fan_in) ** 0.5
        return jax.random.uniform(k, shape, jnp.float32, -bound, bound)

    keys = jax.random.split(key, 12)
    p = {}
    # encoder: Conv2d weights are (Cout, Cin, KH, KW)
    p["e1_w"] = _uniform(keys[0], (16, input_size, 3, 3), input_size * 9)
    p["e1_b"] = _uniform(keys[1], (16,), input_size * 9)
    p["e2_w"] = _uniform(keys[2], (32, 16, 3, 3), 16 * 9)
    p["e2_b"] = _uniform(keys[3], (32,), 16 * 9)
    p["e3_w"] = _uniform(keys[4], (64, 32, 7, 7), 32 * 49)
    p["e3_b"] = _uniform(keys[5], (64,), 32 * 49)
    # decoder: ConvTranspose2d weights are (Cin, Cout, KH, KW)
    p["d1_w"] = _uniform(keys[6], (64, 32, 7, 7), 32 * 49)
    p["d1_b"] = _uniform(keys[7], (32,), 32 * 49)
    p["d2_w"] = _uniform(keys[8], (32, 16, 3, 3), 16 * 9)
    p["d2_b"] = _uniform(keys[9], (16,), 16 * 9)
    p["d3_w"] = _uniform(keys[10], (16, input_size, 3, 3), input_size * 9)
    p["d3_b"] = _uniform(keys[11], (input_size,), input_size * 9)
    return p


def pack_params(p):
    """One-time packing: weight layout transforms, parity scatter, bias tiling,
    bf16 casts — all hoisted out of the jitted forward."""
    def conv_w(w):                               # (Cout,Cin,KH,KW)->(Cout, KH*KW*Cin)
        Cout = w.shape[0]
        return jnp.transpose(w, (0, 2, 3, 1)).reshape(Cout, -1).astype(jnp.bfloat16)

    def convT_w(w):                              # (Cin,Cout,3,3)->(4*Cout,4*Cin) parity
        Cin, Cout = w.shape[0], w.shape[1]
        # o[2r+dr, 2c+dc] += x[r+tr, c+tc] . w[:, :, kh, kw]
        # with kh = dr + 1 - 2*tr, kw = dc + 1 - 2*tc (only valid taps contribute).
        wt = jnp.zeros((2, 2, Cout, 2, 2, Cin), w.dtype)
        for dr in (0, 1):
            for dc in (0, 1):
                for tr in (0, 1):
                    for tc in (0, 1):
                        kh = dr + 1 - 2 * tr
                        kw = dc + 1 - 2 * tc
                        if 0 <= kh <= 2 and 0 <= kw <= 2:
                            wt = wt.at[dr, dc, :, tr, tc, :].set(w[:, :, kh, kw].T)
        return wt.reshape(4 * Cout, 4 * Cin).astype(jnp.bfloat16)

    def col_bias(b):
        return b.reshape(-1, 1).astype(jnp.float32)

    q = {}
    q["e1_wt"], q["e1_b"] = conv_w(p["e1_w"]), col_bias(p["e1_b"])
    q["e2_wt"], q["e2_b"] = conv_w(p["e2_w"]), col_bias(p["e2_b"])
    # latent stage (e3 + d1): rows (cin, i, j) / columns (cout, i, j)
    C_lat, C_mid, Hs, Ws = p["e3_w"].shape       # (64, 32, 7, 7)
    q["e3_wt"] = jnp.transpose(p["e3_w"], (1, 2, 3, 0)).reshape(
        C_mid * Hs * Ws, C_lat).astype(jnp.bfloat16)
    q["e3_b"] = p["e3_b"].reshape(1, C_lat).astype(jnp.float32)
    q["d1_wt"] = p["d1_w"].reshape(C_lat, -1).astype(jnp.float32)   # f32 for 2nd dot
    q["d1_b"] = jnp.repeat(p["d1_b"], Hs * Ws).reshape(1, -1).astype(jnp.float32)
    q["d2_wt"], q["d2_b"] = convT_w(p["d2_w"]), col_bias(jnp.tile(p["d2_b"], 4))
    q["d3_wt"], q["d3_b"] = convT_w(p["d3_w"]), col_bias(jnp.tile(p["d3_b"], 4))
    q["latent_hw"] = (Hs, Ws)
    return q


# ---------------------------------------------------------------------------
# Full forward pass (matches nn.Sequential encoder/decoder semantics)
# ---------------------------------------------------------------------------
def conv_autoencoder_forward(x_nchw, q):
    N = x_nchw.shape[0]
    x = jnp.transpose(x_nchw, (1, 0, 2, 3)).astype(jnp.bfloat16)    # -> (C, N, H, W)
    # encoder
    x = conv2d_cm(x, q["e1_wt"], q["e1_b"], 3, 2, 1, "relu")        # 28 -> 14, C16
    x = conv2d_cm(x, q["e2_wt"], q["e2_b"], 3, 2, 1, "relu")        # 14 -> 7,  C32
    # e3 (valid 7x7) + d1 (7x7 transpose) fused: 7x7 -> 1x1 latent -> 7x7
    C_mid, _, Hs, Ws = x.shape
    x_flat = jnp.transpose(x, (1, 0, 2, 3)).reshape(N, C_mid * Hs * Ws)
    y = latent_fused(x_flat, q["e3_wt"], q["e3_b"], q["d1_wt"], q["d1_b"])
    C_dec = q["d1_wt"].shape[1] // (Hs * Ws)
    x = jnp.transpose(y.reshape(N, C_dec, Hs, Ws), (1, 0, 2, 3))    # back channel-major
    # decoder tail
    x = conv_transpose2d_s2_cm(x, q["d2_wt"], q["d2_b"], "relu")            # 7 -> 14
    x = conv_transpose2d_s2_cm(x, q["d3_wt"], q["d3_b"], "tanh",
                               out_dtype=jnp.float32)                       # 14 -> 28
    return jnp.transpose(x, (1, 0, 2, 3))                            # -> NCHW


# ---------------------------------------------------------------------------
# Independent f32 reference (lax.conv) for the self-check
# ---------------------------------------------------------------------------
def _ref_conv2d(x, w, b, stride, pad):
    w_hwio = jnp.transpose(w, (2, 3, 1, 0))
    y = lax.conv_general_dilated(x, w_hwio, (stride, stride),
                                 [(pad, pad), (pad, pad)],
                                 dimension_numbers=("NHWC", "HWIO", "NHWC"))
    return y + b


def _ref_conv_transpose2d(x, w, b, stride, pad, out_pad):
    KH = w.shape[2]
    w_hwio = jnp.transpose(jnp.flip(w, (2, 3)), (2, 3, 0, 1))
    lo, hi = KH - 1 - pad, KH - 1 - pad + out_pad
    y = lax.conv_general_dilated(x, w_hwio, (1, 1), [(lo, hi), (lo, hi)],
                                 lhs_dilation=(stride, stride),
                                 dimension_numbers=("NHWC", "HWIO", "NHWC"))
    return y + b


def reference_forward(x_nchw, params):
    x = jnp.transpose(x_nchw, (0, 2, 3, 1))
    x = jax.nn.relu(_ref_conv2d(x, params["e1_w"], params["e1_b"], 2, 1))
    x = jax.nn.relu(_ref_conv2d(x, params["e2_w"], params["e2_b"], 2, 1))
    x = _ref_conv2d(x, params["e3_w"], params["e3_b"], 1, 0)
    x = jax.nn.relu(_ref_conv_transpose2d(x, params["d1_w"], params["d1_b"], 1, 0, 0))
    x = jax.nn.relu(_ref_conv_transpose2d(x, params["d2_w"], params["d2_b"], 2, 1, 1))
    x = jnp.tanh(_ref_conv_transpose2d(x, params["d3_w"], params["d3_b"], 2, 1, 1))
    return jnp.transpose(x, (0, 3, 1, 2))


if __name__ == "__main__":
    # Spatial size 28 so the encoder's 7x7 valid conv sees a 7x7 map
    # (28 -> 14 -> 7 -> 1), exactly as the PyTorch module assumes (MNIST-like).
    N, C, H, W = 2, 1, 28, 28
    key = jax.random.PRNGKey(0)
    k_x, k_p = jax.random.split(key)
    x = jax.random.uniform(k_x, (N, C, H, W), jnp.float32, -1.0, 1.0)
    params = init_params(k_p, C)
    packed = pack_params(params)                 # one-time, outside the jitted forward

    fwd = jax.jit(conv_autoencoder_forward)
    out = jax.block_until_ready(fwd(x, packed))

    assert out.shape == (N, C, H, W), f"bad output shape {out.shape}"
    assert bool(jnp.all(jnp.isfinite(out)))

    # Self-check against an independent f32 lax.conv reference (tolerance
    # absorbs the bf16 activation/weight quantization on the Pallas path).
    ref = jax.block_until_ready(jax.jit(reference_forward)(x, params))
    max_err = float(jnp.max(jnp.abs(out - ref)))
    assert max_err < 5e-2, f"mismatch vs reference: {max_err}"

    print("KERNEL_OK")
</pallas_src>

<mosaic_0001>
module attributes {stable_mosaic.version = 11 : i64} {
  func.func @_wtx_bias_act_kernel(%arg0: i32, %arg1: memref<16x9xbf16, #tpu.memory_space<vmem>>, %arg2: memref<9x392xbf16, #tpu.memory_space<vmem>>, %arg3: memref<16x1xf32, #tpu.memory_space<vmem>>, %arg4: memref<16x392xbf16, #tpu.memory_space<vmem>>) attributes {dimension_semantics = [#tpu.dimension_semantics<parallel>], iteration_bounds = array<i64: 1>, scalar_prefetch = 0 : i64, scratch_operands = 0 : i64, tpu.core_type = #tpu.core_type<tc>, window_params = [{pipeline_mode = #tpu.pipeline_mode<synchronous>, transform_indices = @transform_0, window_bounds = array<i64: 16, 9>}, {transform_indices = @transform_1, window_bounds = array<i64: 9, 392>}, {pipeline_mode = #tpu.pipeline_mode<synchronous>, transform_indices = @transform_2, window_bounds = array<i64: 16, 1>}, {transform_indices = @transform_3, window_bounds = array<i64: 16, 392>}]} {
    %c0 = arith.constant 0 : index
    %c0_0 = arith.constant 0 : index
    %0 = vector.load %arg1[%c0, %c0_0] : memref<16x9xbf16, #tpu.memory_space<vmem>>, vector<16x9xbf16>
    %c0_1 = arith.constant 0 : index
    %c0_2 = arith.constant 0 : index
    %1 = vector.load %arg2[%c0_1, %c0_2] : memref<9x392xbf16, #tpu.memory_space<vmem>>, vector<9x392xbf16>
    %cst = arith.constant dense<0.000000e+00> : vector<16x392xf32>
    %2 = tpu.matmul %0, %1, %cst {dimension_numbers = #tpu.dot_dimension_numbers<[1], [0], [0], [1], [0, 0, 1, 1], [], []>} : vector<16x9xbf16>, vector<9x392xbf16>, vector<16x392xf32> -> vector<16x392xf32>
    %c0_3 = arith.constant 0 : index
    %c0_4 = arith.constant 0 : index
    %3 = vector.load %arg3[%c0_3, %c0_4] : memref<16x1xf32, #tpu.memory_space<vmem>>, vector<16x1xf32>
    %4 = vector.broadcast %3 : vector<16x1xf32> to vector<16x392xf32>
    %5 = arith.addf %2, %4 : vector<16x392xf32>
    %cst_5 = arith.constant 0.000000e+00 : f32
    %6 = vector.broadcast %cst_5 : f32 to vector<16x392xf32>
    %7 = arith.maximumf %5, %6 : vector<16x392xf32>
    %8 = arith.truncf %7 : vector<16x392xf32> to vector<16x392xbf16>
    %c0_6 = arith.constant 0 : index
    %c0_7 = arith.constant 0 : index
    %9 = vector.load %arg4[%c0_6, %c0_7] : memref<16x392xbf16, #tpu.memory_space<vmem>>, vector<16x392xbf16>
    tpu.vector_store %arg4[%c0_6, %c0_7], %8 {strides = array<i32>} : memref<16x392xbf16, #tpu.memory_space<vmem>>, vector<16x392xbf16>,
    return
  }
  func.func @transform_0(%arg0: i32) -> (i32, i32) {
    %c0_i32 = arith.constant 0 : i32
    %c0_i32_0 = arith.constant 0 : i32
    %c0_i32_1 = arith.constant 0 : i32
    return %c0_i32, %c0_i32_0 : i32, i32
  }
  func.func @transform_1(%arg0: i32) -> (i32, i32) {
    %c0_i32 = arith.constant 0 : i32
    %c0_i32_0 = arith.constant 0 : i32
    return %c0_i32, %arg0 : i32, i32
  }
  func.func @transform_2(%arg0: i32) -> (i32, i32) {
    %c0_i32 = arith.constant 0 : i32
    %c0_i32_0 = arith.constant 0 : i32
    %c0_i32_1 = arith.constant 0 : i32
    return %c0_i32, %c0_i32_0 : i32, i32
  }
  func.func @transform_3(%arg0: i32) -> (i32, i32) {
    %c0_i32 = arith.constant 0 : i32
    %c0_i32_0 = arith.constant 0 : i32
    return %c0_i32, %arg0 : i32, i32
  }
}

module attributes {stable_mosaic.version = 11 : i64} {
  func.func @_wtx_bias_act_kernel(%arg0: i32, %arg1: memref<32x144xbf16, #tpu.memory_space<vmem>>, %arg2: memref<144x98xbf16, #tpu.memory_space<vmem>>, %arg3: memref<32x1xf32, #tpu.memory_space<vmem>>, %arg4: memref<32x98xbf16, #tpu.memory_space<vmem>>) attributes {dimension_semantics = [#tpu.dimension_semantics<parallel>], iteration_bounds = array<i64: 1>, scalar_prefetch = 0 : i64, scratch_operands = 0 : i64, tpu.core_type = #tpu.core_type<tc>, window_params = [{pipeline_mode = #tpu.pipeline_mode<synchronous>, transform_indices = @transform_0, window_bounds = array<i64: 32, 144>}, {transform_indices = @transform_1, window_bounds = array<i64: 144, 98>}, {pipeline_mode = #tpu.pipeline_mode<synchronous>, transform_indices = @transform_2, window_bounds = array<i64: 32, 1>}, {transform_indices = @transform_3, window_bounds = array<i64: 32, 98>}]} {
    %c0 = arith.constant 0 : index
    %c0_0 = arith.constant 0 : index
    %0 = vector.load %arg1[%c0, %c0_0] : memref<32x144xbf16, #tpu.memory_space<vmem>>, vector<32x144xbf16>
    %c0_1 = arith.constant 0 : index
    %c0_2 = arith.constant 0 : index
    %1 = vector.load %arg2[%c0_1, %c0_2] : memref<144x98xbf16, #tpu.memory_space<vmem>>, vector<144x98xbf16>
    %cst = arith.constant dense<0.000000e+00> : vector<32x98xf32>
    %2 = tpu.matmul %0, %1, %cst {dimension_numbers = #tpu.dot_dimension_numbers<[1], [0], [0], [1], [0, 0, 1, 1], [], []>} : vector<32x144xbf16>, vector<144x98xbf16>, vector<32x98xf32> -> vector<32x98xf32>
    %c0_3 = arith.constant 0 : index
    %c0_4 = arith.constant 0 : index
    %3 = vector.load %arg3[%c0_3, %c0_4] : memref<32x1xf32, #tpu.memory_space<vmem>>, vector<32x1xf32>
    %4 = vector.broadcast %3 : vector<32x1xf32> to vector<32x98xf32>
    %5 = arith.addf %2, %4 : vector<32x98xf32>
    %cst_5 = arith.constant 0.000000e+00 : f32
    %6 = vector.broadcast %cst_5 : f32 to vector<32x98xf32>
    %7 = arith.maximumf %5, %6 : vector<32x98xf32>
    %8 = arith.truncf %7 : vector<32x98xf32> to vector<32x98xbf16>
    %c0_6 = arith.constant 0 : index
    %c0_7 = arith.constant 0 : index
    %9 = vector.load %arg4[%c0_6, %c0_7] : memref<32x98xbf16, #tpu.memory_space<vmem>>, vector<32x98xbf16>
    tpu.vector_store %arg4[%c0_6, %c0_7], %8 {strides = array<i32>} : memref<32x98xbf16, #tpu.memory_space<vmem>>, vector<32x98xbf16>,
    return
  }
  func.func @transform_0(%arg0: i32) -> (i32, i32) {
    %c0_i32 = arith.constant 0 : i32
    %c0_i32_0 = arith.constant 0 : i32
    %c0_i32_1 = arith.constant 0 : i32
    return %c0_i32, %c0_i32_0 : i32, i32
  }
  func.func @transform_1(%arg0: i32) -> (i32, i32) {
    %c0_i32 = arith.constant 0 : i32
    %c0_i32_0 = arith.constant 0 : i32
    return %c0_i32, %arg0 : i32, i32
  }
  func.func @transform_2(%arg0: i32) -> (i32, i32) {
    %c0_i32 = arith.constant 0 : i32
    %c0_i32_0 = arith.constant 0 : i32
    %c0_i32_1 = arith.constant 0 : i32
    return %c0_i32, %c0_i32_0 : i32, i32
  }
  func.func @transform_3(%arg0: i32) -> (i32, i32) {
    %c0_i32 = arith.constant 0 : i32
    %c0_i32_0 = arith.constant 0 : i32
    return %c0_i32, %arg0 : i32, i32
  }
}

module attributes {stable_mosaic.version = 11 : i64} {
  func.func @_latent_kernel(%arg0: i32, %arg1: memref<2x1568xbf16, #tpu.memory_space<vmem>>, %arg2: memref<1568x64xbf16, #tpu.memory_space<vmem>>, %arg3: memref<1x64xf32, #tpu.memory_space<vmem>>, %arg4: memref<64x1568xf32, #tpu.memory_space<vmem>>, %arg5: memref<1x1568xf32, #tpu.memory_space<vmem>>, %arg6: memref<2x1568xbf16, #tpu.memory_space<vmem>>) attributes {dimension_semantics = [#tpu.dimension_semantics<parallel>], iteration_bounds = array<i64: 1>, scalar_prefetch = 0 : i64, scratch_operands = 0 : i64, tpu.core_type = #tpu.core_type<tc>, window_params = [{transform_indices = @transform_0, window_bounds = array<i64: 2, 1568>}, {pipeline_mode = #tpu.pipeline_mode<synchronous>, transform_indices = @transform_1, window_bounds = array<i64: 1568, 64>}, {pipeline_mode = #tpu.pipeline_mode<synchronous>, transform_indices = @transform_2, window_bounds = array<i64: 1, 64>}, {pipeline_mode = #tpu.pipeline_mode<synchronous>, transform_indices = @transform_3, window_bounds = array<i64: 64, 1568>}, {pipeline_mode = #tpu.pipeline_mode<synchronous>, transform_indices = @transform_4, window_bounds = array<i64: 1, 1568>}, {transform_indices = @transform_5, window_bounds = array<i64: 2, 1568>}]} {
    %c0 = arith.constant 0 : index
    %c0_0 = arith.constant 0 : index
    %0 = vector.load %arg1[%c0, %c0_0] : memref<2x1568xbf16, #tpu.memory_space<vmem>>, vector<2x1568xbf16>
    %c0_1 = arith.constant 0 : index
    %c0_2 = arith.constant 0 : index
    %1 = vector.load %arg2[%c0_1, %c0_2] : memref<1568x64xbf16, #tpu.memory_space<vmem>>, vector<1568x64xbf16>
    %cst = arith.constant dense<0.000000e+00> : vector<2x64xf32>
    %2 = tpu.matmul %0, %1, %cst {dimension_numbers = #tpu.dot_dimension_numbers<[1], [0], [0], [1], [0, 0, 1, 1], [], []>} : vector<2x1568xbf16>, vector<1568x64xbf16>, vector<2x64xf32> -> vector<2x64xf32>
    %c0_3 = arith.constant 0 : index
    %c0_4 = arith.constant 0 : index
    %3 = vector.load %arg3[%c0_3, %c0_4] : memref<1x64xf32, #tpu.memory_space<vmem>>, vector<1x64xf32>
    %4 = vector.broadcast %3 : vector<1x64xf32> to vector<2x64xf32>
    %5 = arith.addf %2, %4 : vector<2x64xf32>
    %c0_5 = arith.constant 0 : index
    %c0_6 = arith.constant 0 : index
    %6 = vector.load %arg4[%c0_5, %c0_6] : memref<64x1568xf32, #tpu.memory_space<vmem>>, vector<64x1568xf32>
    %cst_7 = arith.constant dense<0.000000e+00> : vector<2x1568xf32>
    %7 = tpu.matmul %5, %6, %cst_7 {dimension_numbers = #tpu.dot_dimension_numbers<[1], [0], [0], [1], [0, 0, 1, 1], [], []>} : vector<2x64xf32>, vector<64x1568xf32>, vector<2x1568xf32> -> vector<2x1568xf32>
    %c0_8 = arith.constant 0 : index
    %c0_9 = arith.constant 0 : index
    %8 = vector.load %arg5[%c0_8, %c0_9] : memref<1x1568xf32, #tpu.memory_space<vmem>>, vector<1x1568xf32>
    %9 = vector.broadcast %8 : vector<1x1568xf32> to vector<2x1568xf32>
    %10 = arith.addf %7, %9 : vector<2x1568xf32>
    %cst_10 = arith.constant 0.000000e+00 : f32
    %11 = vector.broadcast %cst_10 : f32 to vector<2x1568xf32>
    %12 = arith.maximumf %10, %11 : vector<2x1568xf32>
    %13 = arith.truncf %12 : vector<2x1568xf32> to vector<2x1568xbf16>
    %c0_11 = arith.constant 0 : index
    %c0_12 = arith.constant 0 : index
    %14 = vector.load %arg6[%c0_11, %c0_12] : memref<2x1568xbf16, #tpu.memory_space<vmem>>, vector<2x1568xbf16>
    tpu.vector_store %arg6[%c0_11, %c0_12], %13 {strides = array<i32>} : memref<2x1568xbf16, #tpu.memory_space<vmem>>, vector<2x1568xbf16>,
    return
  }
  func.func @transform_0(%arg0: i32) -> (i32, i32) {
    %c0_i32 = arith.constant 0 : i32
    %c0_i32_0 = arith.constant 0 : i32
    return %arg0, %c0_i32 : i32, i32
  }
  func.func @transform_1(%arg0: i32) -> (i32, i32) {
    %c0_i32 = arith.constant 0 : i32
    %c0_i32_0 = arith.constant 0 : i32
    %c0_i32_1 = arith.constant 0 : i32
    return %c0_i32, %c0_i32_0 : i32, i32
  }
  func.func @transform_2(%arg0: i32) -> (i32, i32) {
    %c0_i32 = arith.constant 0 : i32
    %c0_i32_0 = arith.constant 0 : i32
    %c0_i32_1 = arith.constant 0 : i32
    return %c0_i32, %c0_i32_0 : i32, i32
  }
  func.func @transform_3(%arg0: i32) -> (i32, i32) {
    %c0_i32 = arith.constant 0 : i32
    %c0_i32_0 = arith.constant 0 : i32
    %c0_i32_1 = arith.constant 0 : i32
    return %c0_i32, %c0_i32_0 : i32, i32
  }
  func.func @transform_4(%arg0: i32) -> (i32, i32) {
    %c0_i32 = arith.constant 0 : i32
    %c0_i32_0 = arith.constant 0 : i32
    %c0_i32_1 = arith.constant 0 : i32
    return %c0_i32, %c0_i32_0 : i32, i32
  }
  func.func @transform_5(%arg0: i32) -> (i32, i32) {
    %c0_i32 = arith.constant 0 : i32
    %c0_i32_0 = arith.constant 0 : i32
    return %arg0, %c0_i32 : i32, i32
  }
}

module attributes {stable_mosaic.version = 11 : i64} {
  func.func @_wtx_bias_act_kernel(%arg0: i32, %arg1: memref<64x128xbf16, #tpu.memory_space<vmem>>, %arg2: memref<128x98xbf16, #tpu.memory_space<vmem>>, %arg3: memref<64x1xf32, #tpu.memory_space<vmem>>, %arg4: memref<64x98xbf16, #tpu.memory_space<vmem>>) attributes {dimension_semantics = [#tpu.dimension_semantics<parallel>], iteration_bounds = array<i64: 1>, scalar_prefetch = 0 : i64, scratch_operands = 0 : i64, tpu.core_type = #tpu.core_type<tc>, window_params = [{pipeline_mode = #tpu.pipeline_mode<synchronous>, transform_indices = @transform_0, window_bounds = array<i64: 64, 128>}, {transform_indices = @transform_1, window_bounds = array<i64: 128, 98>}, {pipeline_mode = #tpu.pipeline_mode<synchronous>, transform_indices = @transform_2, window_bounds = array<i64: 64, 1>}, {transform_indices = @transform_3, window_bounds = array<i64: 64, 98>}]} {
    %c0 = arith.constant 0 : index
    %c0_0 = arith.constant 0 : index
    %0 = vector.load %arg1[%c0, %c0_0] : memref<64x128xbf16, #tpu.memory_space<vmem>>, vector<64x128xbf16>
    %c0_1 = arith.constant 0 : index
    %c0_2 = arith.constant 0 : index
    %1 = vector.load %arg2[%c0_1, %c0_2] : memref<128x98xbf16, #tpu.memory_space<vmem>>, vector<128x98xbf16>
    %cst = arith.constant dense<0.000000e+00> : vector<64x98xf32>
    %2 = tpu.matmul %0, %1, %cst {dimension_numbers = #tpu.dot_dimension_numbers<[1], [0], [0], [1], [0, 0, 1, 1], [], []>} : vector<64x128xbf16>, vector<128x98xbf16>, vector<64x98xf32> -> vector<64x98xf32>
    %c0_3 = arith.constant 0 : index
    %c0_4 = arith.constant 0 : index
    %3 = vector.load %arg3[%c0_3, %c0_4] : memref<64x1xf32, #tpu.memory_space<vmem>>, vector<64x1xf32>
    %4 = vector.broadcast %3 : vector<64x1xf32> to vector<64x98xf32>
    %5 = arith.addf %2, %4 : vector<64x98xf32>
    %cst_5 = arith.constant 0.000000e+00 : f32
    %6 = vector.broadcast %cst_5 : f32 to vector<64x98xf32>
    %7 = arith.maximumf %5, %6 : vector<64x98xf32>
    %8 = arith.truncf %7 : vector<64x98xf32> to vector<64x98xbf16>
    %c0_6 = arith.constant 0 : index
    %c0_7 = arith.constant 0 : index
    %9 = vector.load %arg4[%c0_6, %c0_7] : memref<64x98xbf16, #tpu.memory_space<vmem>>, vector<64x98xbf16>
    tpu.vector_store %arg4[%c0_6, %c0_7], %8 {strides = array<i32>} : memref<64x98xbf16, #tpu.memory_space<vmem>>, vector<64x98xbf16>,
    return
  }
  func.func @transform_0(%arg0: i32) -> (i32, i32) {
    %c0_i32 = arith.constant 0 : i32
    %c0_i32_0 = arith.constant 0 : i32
    %c0_i32_1 = arith.constant 0 : i32
    return %c0_i32, %c0_i32_0 : i32, i32
  }
  func.func @transform_1(%arg0: i32) -> (i32, i32) {
    %c0_i32 = arith.constant 0 : i32
    %c0_i32_0 = arith.constant 0 : i32
    return %c0_i32, %arg0 : i32, i32
  }
  func.func @transform_2(%arg0: i32) -> (i32, i32) {
    %c0_i32 = arith.constant 0 : i32
    %c0_i32_0 = arith.constant 0 : i32
    %c0_i32_1 = arith.constant 0 : i32
    return %c0_i32, %c0_i32_0 : i32, i32
  }
  func.func @transform_3(%arg0: i32) -> (i32, i32) {
    %c0_i32 = arith.constant 0 : i32
    %c0_i32_0 = arith.constant 0 : i32
    return %c0_i32, %arg0 : i32, i32
  }
}

module attributes {stable_mosaic.version = 11 : i64} {
  func.func @_wtx_bias_act_kernel(%arg0: i32, %arg1: memref<4x64xbf16, #tpu.memory_space<vmem>>, %arg2: memref<64x392xbf16, #tpu.memory_space<vmem>>, %arg3: memref<4x1xf32, #tpu.memory_space<vmem>>, %arg4: memref<4x392xf32, #tpu.memory_space<vmem>>) attributes {dimension_semantics = [#tpu.dimension_semantics<parallel>], iteration_bounds = array<i64: 1>, scalar_prefetch = 0 : i64, scratch_operands = 0 : i64, tpu.core_type = #tpu.core_type<tc>, window_params = [{pipeline_mode = #tpu.pipeline_mode<synchronous>, transform_indices = @transform_0, window_bounds = array<i64: 4, 64>}, {transform_indices = @transform_1, window_bounds = array<i64: 64, 392>}, {pipeline_mode = #tpu.pipeline_mode<synchronous>, transform_indices = @transform_2, window_bounds = array<i64: 4, 1>}, {transform_indices = @transform_3, window_bounds = array<i64: 4, 392>}]} {
    %c0 = arith.constant 0 : index
    %c0_0 = arith.constant 0 : index
    %0 = vector.load %arg1[%c0, %c0_0] : memref<4x64xbf16, #tpu.memory_space<vmem>>, vector<4x64xbf16>
    %c0_1 = arith.constant 0 : index
    %c0_2 = arith.constant 0 : index
    %1 = vector.load %arg2[%c0_1, %c0_2] : memref<64x392xbf16, #tpu.memory_space<vmem>>, vector<64x392xbf16>
    %cst = arith.constant dense<0.000000e+00> : vector<4x392xf32>
    %2 = tpu.matmul %0, %1, %cst {dimension_numbers = #tpu.dot_dimension_numbers<[1], [0], [0], [1], [0, 0, 1, 1], [], []>} : vector<4x64xbf16>, vector<64x392xbf16>, vector<4x392xf32> -> vector<4x392xf32>
    %c0_3 = arith.constant 0 : index
    %c0_4 = arith.constant 0 : index
    %3 = vector.load %arg3[%c0_3, %c0_4] : memref<4x1xf32, #tpu.memory_space<vmem>>, vector<4x1xf32>
    %4 = vector.broadcast %3 : vector<4x1xf32> to vector<4x392xf32>
    %5 = arith.addf %2, %4 : vector<4x392xf32>
    %6 = math.tanh %5 : vector<4x392xf32>
    %c0_5 = arith.constant 0 : index
    %c0_6 = arith.constant 0 : index
    %7 = vector.load %arg4[%c0_5, %c0_6] : memref<4x392xf32, #tpu.memory_space<vmem>>, vector<4x392xf32>
    tpu.vector_store %arg4[%c0_5, %c0_6], %6 {strides = array<i32>} : memref<4x392xf32, #tpu.memory_space<vmem>>, vector<4x392xf32>,
    return
  }
  func.func @transform_0(%arg0: i32) -> (i32, i32) {
    %c0_i32 = arith.constant 0 : i32
    %c0_i32_0 = arith.constant 0 : i32
    %c0_i32_1 = arith.constant 0 : i32
    return %c0_i32, %c0_i32_0 : i32, i32
  }
  func.func @transform_1(%arg0: i32) -> (i32, i32) {
    %c0_i32 = arith.constant 0 : i32
    %c0_i32_0 = arith.constant 0 : i32
    return %c0_i32, %arg0 : i32, i32
  }
  func.func @transform_2(%arg0: i32) -> (i32, i32) {
    %c0_i32 = arith.constant 0 : i32
    %c0_i32_0 = arith.constant 0 : i32
    %c0_i32_1 = arith.constant 0 : i32
    return %c0_i32, %c0_i32_0 : i32, i32
  }
  func.func @transform_3(%arg0: i32) -> (i32, i32) {
    %c0_i32 = arith.constant 0 : i32
    %c0_i32_0 = arith.constant 0 : i32
    return %c0_i32, %arg0 : i32, i32
  }
}

</mosaic_0001>

<bundles_post_ra>
// kernel: conv_autoencoder_forward.5
= control target key start
LH: loop header
LB: loop body
LE: loop exit
PB: predicated region body
PF: predicated region fallthrough
CT: control target
= control target key end

     0   :  { %vm58_vm0 = vcmask 1043456   ;;  %vm59_vm1 = vcmask 1044480   ;;  %v227_v1 = vmov 65535   ;;  %v228_v5 = vmov 0   ;;  %s285_s1 = inlined_call_operand.vmem [shape: bf16[9,392], index: 1, kind: input, shape index: {}]   ;;  %s286_s0 = inlined_call_operand.vmem [shape: bf16[16,9], index: 0, kind: input, shape index: {}]   ;;  %s287_s2 = inlined_call_operand.vmem [shape: f32[16,1], index: 2, kind: input, shape index: {}]   ;;  %s288_s3 = inlined_call_operand.vmem [shape: bf16[16,392], index: 3, kind: output, shape index: {}]  }
   0x1   :  { %v220_v0 = vld [vmem:[%s285_s1 + $0x4] ss:$16 sps:$4 sm:$0x1f]   ;;  %v60_v2 = vsel %vm58_vm0, 4294967295, %v227_v1  ;;  %106 = vmatprep.mubr.bf16.mxu0 %v228_v5  ;;  %149 = vmatprep.mubr.bf16.mxu1 %v228_v5  ;;  %v22_v14 = vld [vmem:[%s287_s2 + $0x8] sm:$0xff]  ;;  %vm54_vm2 = vcmask 72704  }
   0x2   :  { %v61_v3 = vsel %vm59_vm1, %v60_v2, 0  ;;  %v222_v4 = vld [vmem:[%s285_s1 + $0xc] ss:$16 sps:$4 sm:$0x1f]   ;;  %219 = vset.pattern.permute.xlu0 %v228_v5  ;;  %v21_v10 = vld [vmem:[%s287_s2] sm:$0xff]  ;;  %vm193_vm3 = vcmask 64516  }
   0x3   :  { %v66_v6 = vand.u32 %v220_v0, %v61_v3  ;;  %v224_v7 = vld [vmem:[%s285_s1] ss:$16 sps:$4 sm:$0x1f]   ;;  %v225_v8 = vld [vmem:[%s285_s1 + $0x8] ss:$16 sps:$4 sm:$0x1f]   ;;  %v72_v9 = vand.u32 %v222_v4, %v61_v3  ;;  %25 = vperm.xlu0 %219, %v21_v10   ;;  %vm194_vm4 = vmor %vm193_vm3, %vm58_vm0 }
   0x4   :  { %v63_v11 = vand.u32 %v224_v7, %v61_v3  ;;  %v69_v12 = vand.u32 %v225_v8, %v61_v3  ;;  %v226_v13 = vld [vmem:[%s286_s0] sm:$0xff]  }
   0x5   :  { %74 = vmatprep.subr.bf16.mxu0 %v66_v6  ;;  %117 = vmatprep.subr.bf16.mxu1 %v72_v9 }
   0x6   :  { %75 = vmatpush1.bf16.msra.mxu0 %v63_v11  ;;  %118 = vmatpush1.bf16.msra.mxu1 %v69_v12 }
   0x7   :  { %30 = vperm.xlu0 %219, %v22_v14  }
   0x9   :  { %207 = vmatmul.mubr.msk.bf16.vlgmr.msra.gmra.mrb[0].mxu0 %vm54_vm2, %v226_v13  ;;  %208 = vmatmul.mubr.msk.bf16.vlgmr.msra.gmra.mrb[0].mxu1 %vm54_vm2, %v226_v13 }
  0x82   :  { %v26_v15 = vpop.permute.xlu0 %25 }
  0x86   :  { %v31_v16 = vpop.permute.xlu0 %30 }
  0xdc   :  { %v108_v17 = vpop.f32.mrb[0].mxu0  ;;  %v151_v18 = vpop.f32.mrb[0].mxu1 }
  0xdd   :  { %v109_v19 = vadd.f32 %v108_v17, %v26_v15  ;;  %v152_v20 = vadd.f32 %v151_v18, %v26_v15  ;;  %v110_v21 = vpop.f32.mrb[1].mxu0  ;;  %v153_v22 = vpop.f32.mrb[1].mxu1 }
  0xde   :  { %v111_v23 = vadd.f32 %v110_v21, %v26_v15  ;;  %v154_v24 = vadd.f32 %v153_v22, %v26_v15  ;;  %v112_v25 = vpop.f32.mrb[2].mxu0  ;;  %v155_v26 = vpop.f32.mrb[2].mxu1 }
  0xdf   :  { %v160_v27 = vmax.f32 %v109_v19, 0.0  ;;  %v162_v28 = vmax.f32 %v152_v20, 0.0  ;;  %v113_v29 = vadd.f32 %v112_v25, %v31_v16  ;;  %v156_v30 = vadd.f32 %v155_v26, %v31_v16  ;;  %v114_v31 = vpop.f32.mrb[3].mxu0  ;;  %v157_v32 = vpop.f32.mrb[3].mxu1 }
  0xe0   :  { %v161_v33 = vmax.f32 %v111_v23, 0.0  ;;  %v163_v34 = vmax.f32 %v154_v24, 0.0  ;;  %v115_v35 = vadd.f32 %v114_v31, %v31_v16  ;;  %v158_v36 = vadd.f32 %v157_v32, %v31_v16 }
  0xe1   :  { %v164_v37 = vmax.f32 %v113_v29, 0.0  ;;  %v166_v38 = vmax.f32 %v156_v30, 0.0 }
  0xe2   :  { %v213_v39 = vpack.c.bf16 %v161_v33, %v160_v27  ;;  %v214_v40 = vpack.c.bf16 %v163_v34, %v162_v28  ;;  %v165_v41 = vmax.f32 %v115_v35, 0.0  ;;  %v167_v42 = vmax.f32 %v158_v36, 0.0 }
  0xe4   :  { %192 = vst [vmem:[%s288_s3] sm:$0xff] %v213_v39  ;;  %195 = vst.msk [vmem:[%s288_s3 + $0x8] sm:$0xff] %vm194_vm4, %v214_v40  ;;  %v215_v43 = vpack.c.bf16 %v165_v41, %v164_v37  ;;  %v216_v44 = vpack.c.bf16 %v167_v42, %v166_v38 }
  0xe6   :  { %196 = vst [vmem:[%s288_s3 + $0x10] sm:$0xff] %v215_v43  ;;  %197 = vst.msk [vmem:[%s288_s3 + $0x18] sm:$0xff] %vm194_vm4, %v216_v44 }

// kernel: conv_autoencoder_forward.6
= control target key start
LH: loop header
LB: loop body
LE: loop exit
PB: predicated region body
PF: predicated region fallthrough
CT: control target
= control target key end

     0   :  { %v277_v0 = vmov 0   ;;  %vm133_vm0 = vcmask 130048   ;;  %vm209_vm1 = vcmask 797696   ;;  %s361_s1 = inlined_call_operand.vmem [shape: bf16[144,98], index: 1, kind: input, shape index: {}]   ;;  %s362_s0 = inlined_call_operand.vmem [shape: bf16[32,144], index: 0, kind: input, shape index: {}]   ;;  %s363_s2 = inlined_call_operand.vmem [shape: f32[32,1], index: 2, kind: input, shape index: {}]   ;;  %s364_s3 = inlined_call_operand.vmem [shape: bf16[32,98], index: 3, kind: output, shape index: {}]  }
   0x1   :  { %140 = vmatprep.subr.bf16.mxu0 %v277_v0  ;;  %241 = vmatprep.subr.bf16.mxu1 %v277_v0  ;;  %v262_v1 = vld [vmem:[%s361_s1] sm:$0xff]   ;;  %v263_v2 = vld [vmem:[%s361_s1 + $0x8] sm:$0xff]   ;;  %v264_v3 = vld [vmem:[%s361_s1 + $0x10] sm:$0xff]  }
   0x2   :  { %261 = vset.pattern.permute.xlu1 %v277_v0  ;;  %260 = vset.pattern.permute.xlu0 %v277_v0  ;;  %v265_v4 = vld [vmem:[%s361_s1 + $0x18] sm:$0xff]   ;;  %v273_v5 = vld [vmem:[%s362_s0 + $0x4] ss:$8 sps:$4 sm:$0xff]   ;;  %v39_v7 = vld [vmem:[%s363_s2 + $0x10] sm:$0xff] }
   0x3   :  { %141 = vmatpush1.bf16.msra.mxu0 %v262_v1  ;;  %250 = vmatpush1.bf16.msra.mxu1 %v262_v1  ;;  %v276_v6 = vld [vmem:[%s362_s0 + $0x14] ss:$8 sps:$4 sm:$0xff]   ;;  %v37_v8 = vld [vmem:[%s363_s2] sm:$0xff]  ;;  %v38_v11 = vld [vmem:[%s363_s2 + $0x8] sm:$0xff] }
   0x4   :  { %142 = vmatprep.subr.bf16.mxu0 %v277_v0  ;;  %242 = vmatprep.subr.bf16.mxu1 %v277_v0  ;;  %v40_v9 = vld [vmem:[%s363_s2 + $0x18] sm:$0xff]  ;;  %v266_v10 = vld [vmem:[%s361_s1 + $0x20] sm:$0xff]   ;;  %v267_v12 = vld [vmem:[%s361_s1 + $0x28] sm:$0xff]  }
   0x5   :  { %231 = vmatprep.mubr.msk.bf16.mxu0 %vm133_vm0, %v273_v5  ;;  %53 = vperm.xlu1 %261, %v39_v7   ;;  %v268_v13 = vld [vmem:[%s361_s1 + $0x30] sm:$0xff]   ;;  %v269_v14 = vld [vmem:[%s361_s1 + $0x38] sm:$0xff]   ;;  %v270_v15 = vld [vmem:[%s361_s1 + $0x40] sm:$0xff]  }
   0x6   :  { %232 = vmatprep.mubr.msk.bf16.mxu1 %vm133_vm0, %v276_v6  ;;  %43 = vperm.xlu0 %260, %v37_v8   ;;  %v271_v16 = vld [vmem:[%s362_s0] ss:$8 sps:$4 sm:$0xff]   ;;  %v274_v17 = vld [vmem:[%s362_s0 + $0x10] ss:$8 sps:$4 sm:$0xff]  }
   0x7   :  { %143 = vmatpush1.bf16.msra.mxu0 %v263_v2  ;;  %251 = vmatpush1.bf16.msra.mxu1 %v263_v2 }
   0x8   :  { %144 = vmatprep.subr.bf16.mxu0 %v277_v0  ;;  %243 = vmatprep.subr.bf16.mxu1 %v277_v0 }
   0x9   :  { %58 = vperm.xlu1 %261, %v40_v9  }
   0xa   :  { %48 = vperm.xlu0 %260, %v38_v11  }
   0xb   :  { %145 = vmatpush1.bf16.msra.mxu0 %v264_v3  ;;  %252 = vmatpush1.bf16.msra.mxu1 %v264_v3 }
   0xc   :  { %146 = vmatprep.subr.bf16.mxu0 %v277_v0  ;;  %244 = vmatprep.subr.bf16.mxu1 %v277_v0 }
   0xf   :  { %147 = vmatpush1.bf16.msra.mxu0 %v265_v4  ;;  %253 = vmatpush1.bf16.msra.mxu1 %v265_v4 }
  0x10   :  { %148 = vmatprep.subr.bf16.mxu0 %v277_v0  ;;  %245 = vmatprep.subr.bf16.mxu1 %v277_v0 }
  0x13   :  { %149 = vmatpush1.bf16.msra.mxu0 %v266_v10  ;;  %254 = vmatpush1.bf16.msra.mxu1 %v266_v10 }
  0x14   :  { %150 = vmatprep.subr.bf16.mxu0 %v277_v0  ;;  %246 = vmatprep.subr.bf16.mxu1 %v277_v0 }
  0x17   :  { %151 = vmatpush1.bf16.msra.mxu0 %v267_v12  ;;  %255 = vmatpush1.bf16.msra.mxu1 %v267_v12 }
  0x18   :  { %152 = vmatprep.subr.bf16.mxu0 %v277_v0  ;;  %247 = vmatprep.subr.bf16.mxu1 %v277_v0 }
  0x1b   :  { %153 = vmatpush1.bf16.msra.mxu0 %v268_v13  ;;  %256 = vmatpush1.bf16.msra.mxu1 %v268_v13 }
  0x1c   :  { %154 = vmatprep.subr.bf16.mxu0 %v277_v0  ;;  %248 = vmatprep.subr.bf16.mxu1 %v277_v0 }
  0x1f   :  { %155 = vmatpush1.bf16.msra.mxu0 %v269_v14  ;;  %257 = vmatpush1.bf16.msra.mxu1 %v269_v14 }
  0x20   :  { %156 = vmatprep.subr.bf16.mxu0 %v277_v0  ;;  %249 = vmatprep.subr.bf16.mxu1 %v277_v0 }
  0x23   :  { %157 = vmatpush1.bf16.msra.mxu0 %v270_v15  ;;  %258 = vmatpush1.bf16.msra.mxu1 %v270_v15 }
  0x26   :  { %173 = vmatmul.mubr.bf16.vlgmr.msra.gmra.mrb[0].mxu0 %v271_v16  ;;  %181 = vmatmul.mubr.bf16.vlgmr.msra.gmra.mrb[0].mxu1 %v274_v17 }
  0x84   :  { %v54_v18 = vpop.permute.xlu1 %53 }
  0x85   :  { %v44_v19 = vpop.permute.xlu0 %43 }
  0x88   :  { %v59_v20 = vpop.permute.xlu1 %58 }
  0x89   :  { %v49_v21 = vpop.permute.xlu0 %48 }
  0xf9   :  { %v174_v22 = vpop.f32.mrb[0].mxu0  ;;  %v182_v23 = vpop.f32.mrb[0].mxu1 }
  0xfa   :  { %v175_v24 = vadd.f32 %v174_v22, %v44_v19  ;;  %v183_v25 = vadd.f32 %v182_v23, %v54_v18  ;;  %v176_v26 = vpop.f32.mrb[1].mxu0  ;;  %v184_v27 = vpop.f32.mrb[1].mxu1 }
  0xfb   :  { %v177_v28 = vpop.f32.mrb[2].mxu0  ;;  %v185_v29 = vpop.f32.mrb[2].mxu1 }
  0xfc   :  { %v189_v30 = vmax.f32 %v175_v24, 0.0  ;;  %v191_v31 = vmax.f32 %v183_v25, 0.0  ;;  %v178_v32 = vadd.f32 %v177_v28, %v49_v21  ;;  %v186_v33 = vadd.f32 %v185_v29, %v59_v20  ;;  %v179_v34 = vpop.f32.mrb[3].mxu0  ;;  %v187_v35 = vpop.f32.mrb[3].mxu1 }
  0xfe   :  { %v237_v36 = vpack.c.bf16 %v189_v30, %v189_v30  ;;  %v239_v37 = vpack.c.bf16 %v191_v31, %v191_v31  ;;  %v190_v38 = vmax.f32 %v178_v32, 0.0  ;;  %v192_v39 = vmax.f32 %v186_v33, 0.0 }
 0x100   :  { %210 = vst.msk [vmem:[%s364_s3] sm:$0xf] %vm209_vm1, %v237_v36  ;;  %212 = vst.msk [vmem:[%s364_s3 + $0x8] sm:$0xf] %vm209_vm1, %v239_v37  ;;  %v238_v40 = vpack.c.bf16 %v190_v38, %v190_v38  ;;  %v240_v41 = vpack.c.bf16 %v192_v39, %v192_v39 }
 0x102   :  { %211 = vst.msk [vmem:[%s364_s3 + $0x4] sm:$0xf] %vm209_vm1, %v238_v40  ;;  %213 = vst.msk [vmem:[%s364_s3 + $0xc] sm:$0xf] %vm209_vm1, %v240_v41 }

// kernel: conv_autoencoder_forward.7
= control target key start
LH: loop header
LB: loop body
LE: loop exit
PB: predicated region body
PF: predicated region fallthrough
CT: control target
= control target key end

     0   :  { %v2513_v22 = vmov 1966171168   ;;  %v232_v24 = vlaneseq  ;;  %vm2515_vm0 = vmmov 0   ;;  %vm916_vm1 = vcmask 261120   ;;  %s3252_s1 = inlined_call_operand.vmem [shape: bf16[1568,64], index: 1, kind: input, shape index: {}]   ;;  %s3253_s0 = inlined_call_operand.vmem [shape: bf16[2,1568], index: 0, kind: input, shape index: {}]   ;;  %s3254_s3 = inlined_call_operand.vmem [shape: f32[64,1568], index: 3, kind: input, shape index: {}]   ;;  %s3255_s2 = inlined_call_operand.vmem [shape: f32[1,64], index: 2, kind: input, shape index: {}]   ;;  %s3256_s4 = inlined_call_operand.vmem [shape: f32[1,1568], index: 4, kind: input, shape index: {}]   ;;  %s3257_s5 = inlined_call_operand.vmem [shape: bf16[2,1568], index: 5, kind: output, shape index: {}]  }
   0x1   :  { %v2413_v0 = vld [vmem:[%s3252_s1 + $0x40] sm:$0xff]   ;;  %v2417_v4 = vld [vmem:[%s3252_s1 + $0x48] sm:$0xff]   ;;  %v2421_v8 = vld [vmem:[%s3252_s1 + $0x50] sm:$0xff]   ;;  %v230_v23 = vunpack.c.l.s4 %v2513_v22  ;;  %vm1373_vm2 = vcmask 523264   ;;  %vm2003_vm3 = vcmask 1040384   ;;  %vm2004_vm4 = vcmask 1041409  }
   0x2   :  { %v2414_v1 = vld [vmem:[%s3252_s1] sm:$0xff]   ;;  %2130 = vmatprep.subr.bf16.mxu0 %v2413_v0  ;;  %v2418_v5 = vld [vmem:[%s3252_s1 + $0x8] sm:$0xff]   ;;  %v2422_v9 = vld [vmem:[%s3252_s1 + $0x10] sm:$0xff]   ;;  %v2625_v30 = vshrl.u32 %v232_v24, 7  ;;  %vm2006_vm6 = vcmask 1042434   ;;  %vm2008_vm8 = vcmask 1043459  }
   0x3   :  { %v2415_v2 = vld [vmem:[%s3252_s1 + $0xc0] sm:$0xff]   ;;  %2131 = vmatpush3.bf16.msra.mxu0 %v2414_v1  ;;  %v2419_v6 = vld [vmem:[%s3252_s1 + $0xc8] sm:$0xff]   ;;  %v2423_v10 = vld [vmem:[%s3252_s1 + $0xd0] sm:$0xff]   ;;  %v231_v29 = vunpack.c.0.s8 %v230_v23  ;;  %vm2010_vm10 = vcmask 258052  }
   0x4   :  { %v2416_v3 = vld [vmem:[%s3252_s1 + $0x80] sm:$0xff]   ;;  %2152 = vmatprep.subr.bf16.mxu1 %v2415_v2  ;;  %2132 = vmatprep.subr.bf16.mxu0 %v2417_v4  ;;  %v2420_v7 = vld [vmem:[%s3252_s1 + $0x88] sm:$0xff]   ;;  %v2424_v11 = vld [vmem:[%s3252_s1 + $0x90] sm:$0xff]  }
   0x5   :  { %2153 = vmatpush3.bf16.msra.mxu1 %v2416_v3  ;;  %v2425_v12 = vld [vmem:[%s3252_s1 + $0x58] sm:$0xff]   ;;  %v2429_v16 = vld [vmem:[%s3252_s1 + $0x60] sm:$0xff]   ;;  %v2433_v20 = vld [vmem:[%s3252_s1 + $0x68] sm:$0xff]   ;;  %v2640_v35 = vsub.s32 %v231_v29, %v2625_v30 }
   0x6   :  { %2154 = vmatprep.subr.bf16.mxu1 %v2419_v6  ;;  %v2426_v13 = vld [vmem:[%s3252_s1 + $0x18] sm:$0xff]   ;;  %v2430_v17 = vld [vmem:[%s3252_s1 + $0x20] sm:$0xff]   ;;  %v2434_v21 = vld [vmem:[%s3252_s1 + $0x28] sm:$0xff]  }
   0x7   :  { %2133 = vmatpush3.bf16.msra.mxu0 %v2418_v5  ;;  %v2427_v14 = vld [vmem:[%s3252_s1 + $0xd8] sm:$0xff]   ;;  %v2431_v18 = vld [vmem:[%s3252_s1 + $0xe0] sm:$0xff]   ;;  %v2435_v25 = vld [vmem:[%s3252_s1 + $0xe8] sm:$0xff]  }
   0x8   :  { %2134 = vmatprep.subr.bf16.mxu0 %v2421_v8  ;;  %v2428_v15 = vld [vmem:[%s3252_s1 + $0x98] sm:$0xff]   ;;  %v2432_v19 = vld [vmem:[%s3252_s1 + $0xa0] sm:$0xff]   ;;  %v2436_v26 = vld [vmem:[%s3252_s1 + $0xa8] sm:$0xff]  }
   0x9   :  { %2155 = vmatpush3.bf16.msra.mxu1 %v2420_v7  ;;  %v2437_v27 = vld [vmem:[%s3252_s1 + $0x70] sm:$0xff]   ;;  %v2441_v33 = vld [vmem:[%s3252_s1 + $0x78] sm:$0xff]   ;;  %v21_v38 = vld [vmem:[%s3253_s0] sm:$0xff] }
   0xa   :  { %2156 = vmatprep.subr.bf16.mxu1 %v2423_v10  ;;  %v2438_v28 = vld [vmem:[%s3252_s1 + $0x30] sm:$0xff]   ;;  %v2442_v34 = vld [vmem:[%s3252_s1 + $0x38] sm:$0xff]   ;;  %v228_v39 = vcombine.high %v21_v38, %v21_v38  ;;  %v235_v40 = vrot.slane %v21_v38, %v2640_v35  ;;  %v2447_v41 = vld [vmem:[%s3252_s1 + $0x140] sm:$0xff]  }
   0xb   :  { %2135 = vmatpush3.bf16.msra.mxu0 %v2422_v9  ;;  %v2439_v31 = vld [vmem:[%s3252_s1 + $0xf0] sm:$0xff]   ;;  %v2443_v36 = vld [vmem:[%s3252_s1 + $0xf8] sm:$0xff]   ;;  %v2449_v44 = vld [vmem:[%s3252_s1 + $0x1c0] sm:$0xff]  }
   0xc   :  { %2136 = vmatprep.subr.bf16.mxu0 %v2425_v12  ;;  %v2440_v32 = vld [vmem:[%s3252_s1 + $0xb0] sm:$0xff]   ;;  %v2444_v37 = vld [vmem:[%s3252_s1 + $0xb8] sm:$0xff]   ;;  %v243_v42 = vcombine.high %v235_v40, %v235_v40  ;;  %v251_v43 = vrot.slane %v235_v40, %v2640_v35  ;;  %v2660_v45 = vrot.slane %v228_v39, %v2640_v35  ;;  %v2448_v47 = vld [vmem:[%s3252_s1 + $0x100] sm:$0xff]  }
   0xd   :  { %2157 = vmatpush3.bf16.msra.mxu1 %v2424_v11  ;;  %v2451_v50 = vld [vmem:[%s3252_s1 + $0x148] sm:$0xff]   ;;  %v2450_v52 = vld [vmem:[%s3252_s1 + $0x180] sm:$0xff]   ;;  %v2455_v57 = vld [vmem:[%s3252_s1 + $0x150] sm:$0xff]  }
   0xe   :  { %2158 = vmatprep.subr.bf16.mxu1 %v2427_v14  ;;  %v265_v46 = vrot.slane %v243_v42, %v2640_v35  ;;  %v244_v48 = vcombine.high %v2660_v45, %v2660_v45  ;;  %v273_v49 = vcombine.high %v251_v43, %v251_v43  ;;  %v2453_v54 = vld [vmem:[%s3252_s1 + $0x1c8] sm:$0xff]   ;;  %v2457_v59 = vld [vmem:[%s3252_s1 + $0x1d0] sm:$0xff]   ;;  %v2459_v61 = vld [vmem:[%s3252_s1 + $0x158] sm:$0xff]  }
   0xf   :  { %2137 = vmatpush3.bf16.msra.mxu0 %v2426_v13  ;;  %v2452_v55 = vld [vmem:[%s3252_s1 + $0x108] sm:$0xff]   ;;  %v2456_v60 = vld [vmem:[%s3252_s1 + $0x110] sm:$0xff]   ;;  %v2461_v63 = vld [vmem:[%s3252_s1 + $0x1d8] sm:$0xff]  }
  0x10   :  { %2138 = vmatprep.subr.bf16.mxu0 %v2429_v16  ;;  %952 = vmatprep.mubr.bf16.mxu0 %v265_v46  ;;  %v275_v51 = vcombine.high %v265_v46, %v265_v46  ;;  %v272_v53 = vrot.slane %v244_v48, %v2640_v35  ;;  %v2454_v58 = vld [vmem:[%s3252_s1 + $0x188] sm:$0xff]   ;;  %v2458_v62 = vld [vmem:[%s3252_s1 + $0x190] sm:$0xff]   ;;  %v2460_v0 = vld [vmem:[%s3252_s1 + $0x118] sm:$0xff]  }
  0x11   :  { %2159 = vmatpush3.bf16.msra.mxu1 %v2428_v15  ;;  %v2463_v1 = vld [vmem:[%s3252_s1 + $0x160] sm:$0xff]   ;;  %v2462_v2 = vld [vmem:[%s3252_s1 + $0x198] sm:$0xff]   ;;  %v2720_v5 = vld [vmem:[%s3253_s0 + $0x8] sm:$0x1f] }
  0x12   :  { %2160 = vmatprep.subr.bf16.mxu1 %v2431_v18  ;;  %992 = vmatprep.mubr.bf16.mxu1 %v275_v51  ;;  %v276_v56 = vcombine.high %v272_v53, %v272_v53  ;;  %v2465_v3 = vld [vmem:[%s3252_s1 + $0x1e0] sm:$0xff]   ;;  %v2467_v6 = vld [vmem:[%s3252_s1 + $0x168] sm:$0xff]   ;;  %v2471_v10 = vld [vmem:[%s3252_s1 + $0x170] sm:$0xff]   ;;  %v2742_v12 = vrot.slane %v2720_v5, %v2640_v35 }
  0x13   :  { %2139 = vmatpush3.bf16.msra.mxu0 %v2430_v17  ;;  %v2464_v4 = vld [vmem:[%s3252_s1 + $0x120] sm:$0xff]   ;;  %v2469_v8 = vld [vmem:[%s3252_s1 + $0x1e8] sm:$0xff]   ;;  %v2473_v13 = vld [vmem:[%s3252_s1 + $0x1f0] sm:$0xff]  }
  0x14   :  { %2140 = vmatprep.subr.bf16.mxu0 %v2433_v20  ;;  %v2466_v7 = vld [vmem:[%s3252_s1 + $0x1a0] sm:$0xff]   ;;  %v2468_v9 = vld [vmem:[%s3252_s1 + $0x128] sm:$0xff]   ;;  %v2472_v14 = vld [vmem:[%s3252_s1 + $0x130] sm:$0xff]   ;;  %v292_v17 = vcombine.high %v2742_v12, %v2742_v12  ;;  %v258_v20 = vrot.slane %v2660_v45, %v2640_v35 }
  0x15   :  { %2161 = vmatpush3.bf16.msra.mxu1 %v2432_v19  ;;  %v2470_v11 = vld [vmem:[%s3252_s1 + $0x1a8] sm:$0xff]   ;;  %v2475_v15 = vld [vmem:[%s3252_s1 + $0x178] sm:$0xff]   ;;  %v2474_v16 = vld [vmem:[%s3252_s1 + $0x1b0] sm:$0xff]  }
  0x16   :  { %2162 = vmatprep.subr.bf16.mxu1 %v2435_v25  ;;  %v2477_v18 = vld [vmem:[%s3252_s1 + $0x1f8] sm:$0xff]   ;;  %v313_v23 = vrot.slane %v292_v17, %v2640_v35  ;;  %v2481_v24 = vld [vmem:[%s3252_s1 + $0x2c0] sm:$0xff]   ;;  %v2490_v39 = vld [vmem:[%s3252_s1 + $0x290] sm:$0xff]  }
  0x17   :  { %2141 = vmatpush3.bf16.msra.mxu0 %v2434_v21  ;;  %v2476_v19 = vld [vmem:[%s3252_s1 + $0x138] sm:$0xff]   ;;  %v2479_v21 = vld [vmem:[%s3252_s1 + $0x240] sm:$0xff]   ;;  %v2499_v46 = vld [vmem:[%s3252_s1 + $0x268] sm:$0xff]  }
  0x18   :  { %2142 = vmatprep.subr.bf16.mxu0 %v2437_v27  ;;  %v2478_v22 = vld [vmem:[%s3252_s1 + $0x1b8] sm:$0xff]   ;;  %v2480_v25 = vld [vmem:[%s3252_s1 + $0x200] sm:$0xff]   ;;  %v2483_v27 = vld [vmem:[%s3252_s1 + $0x248] sm:$0xff]   ;;  %v315_v29 = vcombine.high %v313_v23, %v313_v23 }
  0x19   :  { %2163 = vmatpush3.bf16.msra.mxu1 %v2436_v26  ;;  %v274_v26 = vcombine.high %v258_v20, %v258_v20  ;;  %v2491_v38 = vld [vmem:[%s3252_s1 + $0x258] sm:$0xff]   ;;  %v2495_v42 = vld [vmem:[%s3252_s1 + $0x260] sm:$0xff]   ;;  %v2501_v48 = vld [vmem:[%s3252_s1 + $0x2e8] sm:$0xff]  }
  0x1a   :  { %2164 = vmatprep.subr.bf16.mxu1 %v2439_v31  ;;  %v2485_v31 = vld [vmem:[%s3252_s1 + $0x2c8] sm:$0xff]   ;;  %v2493_v40 = vld [vmem:[%s3252_s1 + $0x2d8] sm:$0xff]   ;;  %v2496_v45 = vld [vmem:[%s3252_s1 + $0x220] sm:$0xff]  }
  0x1b   :  { %2143 = vmatpush3.bf16.msra.mxu0 %v2438_v28  ;;  %v2482_v28 = vld [vmem:[%s3252_s1 + $0x280] sm:$0xff]   ;;  %v2502_v51 = vld [vmem:[%s3252_s1 + $0x2a8] sm:$0xff]   ;;  %vm2005_vm5 = vmor %vm2004_vm4, %vm2003_vm3 }
  0x1c   :  { %2144 = vmatprep.subr.bf16.mxu0 %v2441_v33  ;;  %v2487_v33 = vld [vmem:[%s3252_s1 + $0x250] sm:$0xff]   ;;  %v1229_v17 = vld [vmem:[%s3254_s3 + $0xe8] sm:$0xff]  ;;  %vm2007_vm7 = vmor %vm2006_vm6, %vm2005_vm5 }
  0x1d   :  { %2165 = vmatpush3.bf16.msra.mxu1 %v2440_v32  ;;  %v2484_v32 = vld [vmem:[%s3252_s1 + $0x208] sm:$0xff]   ;;  %vm2009_vm9 = vmor %vm2008_vm8, %vm2007_vm7 }
  0x1e   :  { %2166 = vmatprep.subr.bf16.mxu1 %v2443_v36  ;;  %v2489_v36 = vld [vmem:[%s3252_s1 + $0x2d0] sm:$0xff]   ;;  %vm2011_vm11 = vmor %vm2010_vm10, %vm2009_vm9 }
  0x1f   :  { %2145 = vmatpush3.bf16.msra.mxu0 %v2442_v34  ;;  %v2486_v34 = vld [vmem:[%s3252_s1 + $0x288] sm:$0xff]  }
  0x20   :  { %2174 = vmatprep.subr.bf16.mxu0 %v2447_v41  ;;  %v2492_v41 = vld [vmem:[%s3252_s1 + $0x218] sm:$0xff]  }
  0x21   :  { %2167 = vmatpush3.bf16.msra.mxu1 %v2444_v37  ;;  %v2488_v37 = vld [vmem:[%s3252_s1 + $0x210] sm:$0xff]  }
  0x22   :  { %2196 = vmatprep.subr.bf16.mxu1 %v2449_v44  ;;  %953 = vmatmul.mubr.bf16.vlgmr.msra.gmra.mrb[0].mxu0 %v251_v43  ;;  %v2494_v43 = vld [vmem:[%s3252_s1 + $0x298] sm:$0xff]   ;;  %v2497_v44 = vld [vmem:[%s3252_s1 + $0x2e0] sm:$0xff]  }
  0x23   :  { %2175 = vmatpush3.bf16.msra.mxu0 %v2448_v47  ;;  %1032 = vmatprep.mubr.bf16.mxu0 %v272_v53  ;;  %v2498_v47 = vld [vmem:[%s3252_s1 + $0x2a0] sm:$0xff]   ;;  %v2504_v53 = vld [vmem:[%s3252_s1 + $0x230] sm:$0xff]  }
  0x24   :  { %993 = vmatmul.mubr.bf16.vlgmr.msra.gmra.mrb[0].mxu1 %v273_v49  ;;  %2176 = vmatprep.subr.bf16.mxu0 %v2451_v50  ;;  %v2500_v49 = vld [vmem:[%s3252_s1 + $0x228] sm:$0xff]   ;;  %v2503_v50 = vld [vmem:[%s3252_s1 + $0x270] sm:$0xff]  }
  0x25   :  { %2197 = vmatpush3.bf16.msra.mxu1 %v2450_v52  ;;  %1072 = vmatprep.mubr.bf16.mxu1 %v276_v56  ;;  %v2505_v52 = vld [vmem:[%s3252_s1 + $0x2f0] sm:$0xff]   ;;  %v2509_v56 = vld [vmem:[%s3252_s1 + $0x2f8] sm:$0xff]  }
  0x26   :  { %2198 = vmatprep.subr.bf16.mxu1 %v2453_v54  ;;  %v2507_v54 = vld [vmem:[%s3252_s1 + $0x278] sm:$0xff]  }
  0x27   :  { %2177 = vmatpush3.bf16.msra.mxu0 %v2452_v55  ;;  %v2506_v55 = vld [vmem:[%s3252_s1 + $0x2b0] sm:$0xff]  }
  0x28   :  { %2178 = vmatprep.subr.bf16.mxu0 %v2455_v57  ;;  %v2508_v57 = vld [vmem:[%s3252_s1 + $0x238] sm:$0xff]  }
  0x29   :  { %2199 = vmatpush3.bf16.msra.mxu1 %v2454_v58  ;;  %v299_v58 = vrot.slane %v2742_v12, %v2640_v35  ;;  %v1202_v12 = vld [vmem:[%s3254_s3 + $0x10] sm:$0xff] }
  0x2a   :  { %2200 = vmatprep.subr.bf16.mxu1 %v2457_v59  ;;  %v2510_v59 = vld [vmem:[%s3252_s1 + $0x2b8] sm:$0xff]  }
  0x2b   :  { %2179 = vmatpush3.bf16.msra.mxu0 %v2456_v60  ;;  %v277_v60 = vcombine.high %v2720_v5, %v2720_v5  ;;  %v1203_v5 = vld [vmem:[%s3254_s3 + $0x18] sm:$0xff] }
  0x2c   :  { %2180 = vmatprep.subr.bf16.mxu0 %v2459_v61  ;;  %v2511_v61 = vld [vmem:[%s3252_s1 + $0x300] sm:$0xff]  }
  0x2d   :  { %2201 = vmatpush3.bf16.msra.mxu1 %v2458_v62  ;;  %v2514_v62 = vmov 0.0  }
  0x2e   :  { %2202 = vmatprep.subr.bf16.mxu1 %v2461_v63  ;;  %v314_v63 = vcombine.high %v299_v58, %v299_v58 }
  0x2f   :  { %2181 = vmatpush3.bf16.msra.mxu0 %v2460_v0  ;;  %v291_v0 = vrot.slane %v277_v60, %v2640_v35  ;;  %v2017_v60 = vld [vmem:[%s3255_s2] ss:$0 sm:$0xff] }
  0x30   :  { %2182 = vmatprep.subr.bf16.mxu0 %v2463_v1  ;;  %v2512_v1 = vld [vmem:[%s3252_s1 + $0x308] sm:$0xff]  }
  0x31   :  { %2203 = vmatpush3.bf16.msra.mxu1 %v2462_v2  ;;  %v306_v2 = vrot.slane %v291_v0, %v2640_v35 }
  0x32   :  { %2204 = vmatprep.subr.bf16.mxu1 %v2465_v3  ;;  %v1201_v3 = vld [vmem:[%s3254_s3 + $0x8] sm:$0xff] }
  0x33   :  { %2183 = vmatpush3.bf16.msra.mxu0 %v2464_v4  ;;  %v1214_v4 = vld [vmem:[%s3254_s3 + $0x70] sm:$0xff] }
  0x34   :  { %2184 = vmatprep.subr.bf16.mxu0 %v2467_v6  ;;  %v2301_v6 = vpack.c.bf16 %v1214_v4, %v1201_v3 }
  0x35   :  { %2205 = vmatpush3.bf16.msra.mxu1 %v2466_v7  ;;  %v1216_v7 = vld [vmem:[%s3254_s3 + $0x80] sm:$0xff] }
  0x36   :  { %2206 = vmatprep.subr.bf16.mxu1 %v2469_v8  ;;  %v1200_v8 = vld [vmem:[%s3254_s3] sm:$0xff] }
  0x37   :  { %2185 = vmatpush3.bf16.msra.mxu0 %v2468_v9  ;;  %v1213_v9 = vld [vmem:[%s3254_s3 + $0x68] sm:$0xff] }
  0x38   :  { %2186 = vmatprep.subr.bf16.mxu0 %v2471_v10  ;;  %v2317_v10 = vpack.c.bf16 %v1216_v7, %v1203_v5 }
  0x39   :  { %2207 = vmatpush3.bf16.msra.mxu1 %v2470_v11  ;;  %v2303_v11 = vpack.c.bf16 %v1213_v9, %v1200_v8 }
  0x3a   :  { %2208 = vmatprep.subr.bf16.mxu1 %v2473_v13  ;;  %v1215_v13 = vld [vmem:[%s3254_s3 + $0x78] sm:$0xff] }
  0x3b   :  { %2187 = vmatpush3.bf16.msra.mxu0 %v2472_v14  ;;  %v1227_v14 = vld [vmem:[%s3254_s3 + $0xd8] sm:$0xff] }
  0x3c   :  { %2188 = vmatprep.subr.bf16.mxu0 %v2475_v15  ;;  %v2319_v15 = vpack.c.bf16 %v1215_v13, %v1202_v12 }
  0x3d   :  { %2209 = vmatpush3.bf16.msra.mxu1 %v2474_v16  ;;  %v1240_v16 = vld [vmem:[%s3254_s3 + $0x140] sm:$0xff] }
  0x3e   :  { %2210 = vmatprep.subr.bf16.mxu1 %v2477_v18  ;;  %v1242_v18 = vld [vmem:[%s3254_s3 + $0x150] sm:$0xff] }
  0x3f   :  { %2189 = vmatpush3.bf16.msra.mxu0 %v2476_v19  ;;  %v2305_v19 = vpack.c.bf16 %v1240_v16, %v1227_v14 }
  0x40   :  { %2218 = vmatprep.subr.bf16.mxu0 %v2479_v21  ;;  %v1226_v21 = vld [vmem:[%s3254_s3 + $0xd0] sm:$0xff] }
  0x41   :  { %2211 = vmatpush3.bf16.msra.mxu1 %v2478_v22  ;;  %v1239_v22 = vld [vmem:[%s3254_s3 + $0x138] sm:$0xff] }
  0x42   :  { %1033 = vmatmul.mubr.bf16.vlgmr.msra.gmra.mrb[4].mxu0 %v258_v20  ;;  %2240 = vmatprep.subr.bf16.mxu1 %v2481_v24  ;;  %v2321_v20 = vpack.c.bf16 %v1242_v18, %v1229_v17  ;;  %v2307_v24 = vpack.c.bf16 %v1239_v22, %v1226_v21 }
  0x43   :  { %2219 = vmatpush3.bf16.msra.mxu0 %v2480_v25  ;;  %1112 = vmatprep.mubr.bf16.mxu0 %v313_v23  ;;  %v1228_v23 = vld [vmem:[%s3254_s3 + $0xe0] sm:$0xff]  ;;  %v1241_v25 = vld [vmem:[%s3254_s3 + $0x148] sm:$0xff] }
  0x44   :  { %1073 = vmatmul.mubr.bf16.vlgmr.msra.gmra.mrb[4].mxu1 %v274_v26  ;;  %2220 = vmatprep.subr.bf16.mxu0 %v2483_v27  ;;  %v2323_v26 = vpack.c.bf16 %v1241_v25, %v1228_v23  ;;  %v1253_v27 = vld [vmem:[%s3254_s3 + $0x1a8] sm:$0xff] }
  0x45   :  { %2241 = vmatpush3.bf16.msra.mxu1 %v2482_v28  ;;  %1152 = vmatprep.mubr.bf16.mxu1 %v315_v29  ;;  %v1266_v28 = vld [vmem:[%s3254_s3 + $0x210] sm:$0xff]  ;;  %v1255_v29 = vld [vmem:[%s3254_s3 + $0x1b8] sm:$0xff] }
  0x46   :  { %2242 = vmatprep.subr.bf16.mxu1 %v2485_v31  ;;  %v2309_v31 = vpack.c.bf16 %v1266_v28, %v1253_v27 }
  0x47   :  { %2221 = vmatpush3.bf16.msra.mxu0 %v2484_v32  ;;  %v1268_v32 = vld [vmem:[%s3254_s3 + $0x220] sm:$0xff] }
  0x48   :  { %2222 = vmatprep.subr.bf16.mxu0 %v2487_v33  ;;  %v1252_v33 = vld [vmem:[%s3254_s3 + $0x1a0] sm:$0xff] }
  0x49   :  { %2243 = vmatpush3.bf16.msra.mxu1 %v2486_v34  ;;  %v1265_v34 = vld [vmem:[%s3254_s3 + $0x208] sm:$0xff] }
  0x4a   :  { %2244 = vmatprep.subr.bf16.mxu1 %v2489_v36  ;;  %v2325_v36 = vpack.c.bf16 %v1268_v32, %v1255_v29  ;;  %v1204_v32 = vld [vmem:[%s3254_s3 + $0x20] sm:$0xff] }
  0x4b   :  { %2223 = vmatpush3.bf16.msra.mxu0 %v2488_v37  ;;  %v2311_v37 = vpack.c.bf16 %v1265_v34, %v1252_v33  ;;  %v1217_v33 = vld [vmem:[%s3254_s3 + $0x88] sm:$0xff] }
  0x4c   :  { %2224 = vmatprep.subr.bf16.mxu0 %v2491_v38  ;;  %v1254_v38 = vld [vmem:[%s3254_s3 + $0x1b0] sm:$0xff] }
  0x4d   :  { %2245 = vmatpush3.bf16.msra.mxu1 %v2490_v39  ;;  %v1267_v39 = vld [vmem:[%s3254_s3 + $0x218] sm:$0xff] }
  0x4e   :  { %2246 = vmatprep.subr.bf16.mxu1 %v2493_v40  ;;  %v2327_v40 = vpack.c.bf16 %v1267_v39, %v1254_v38  ;;  %v1231_v38 = vld [vmem:[%s3254_s3 + $0xf8] sm:$0xff] }
  0x4f   :  { %2225 = vmatpush3.bf16.msra.mxu0 %v2492_v41  ;;  %v1279_v41 = vld [vmem:[%s3254_s3 + $0x278] sm:$0xff] }
  0x50   :  { %2226 = vmatprep.subr.bf16.mxu0 %v2495_v42  ;;  %v1292_v42 = vld [vmem:[%s3254_s3 + $0x2e0] sm:$0xff] }
  0x51   :  { %2247 = vmatpush3.bf16.msra.mxu1 %v2494_v43  ;;  %v1281_v43 = vld [vmem:[%s3254_s3 + $0x288] sm:$0xff] }
  0x52   :  { %2248 = vmatprep.subr.bf16.mxu1 %v2497_v44  ;;  %v2313_v44 = vpack.c.bf16 %v1292_v42, %v1279_v41  ;;  %v1233_v41 = vld [vmem:[%s3254_s3 + $0x108] sm:$0xff]  ;;  %v1246_v42 = vld [vmem:[%s3254_s3 + $0x170] sm:$0xff] }
  0x53   :  { %2227 = vmatpush3.bf16.msra.mxu0 %v2496_v45  ;;  %v1294_v45 = vld [vmem:[%s3254_s3 + $0x2f0] sm:$0xff] }
  0x54   :  { %2228 = vmatprep.subr.bf16.mxu0 %v2499_v46  ;;  %v1278_v46 = vld [vmem:[%s3254_s3 + $0x270] sm:$0xff] }
  0x55   :  { %2249 = vmatpush3.bf16.msra.mxu1 %v2498_v47  ;;  %v1291_v47 = vld [vmem:[%s3254_s3 + $0x2d8] sm:$0xff] }
  0x56   :  { %2250 = vmatprep.subr.bf16.mxu1 %v2501_v48  ;;  %v2329_v48 = vpack.c.bf16 %v1294_v45, %v1281_v43 }
  0x57   :  { %2229 = vmatpush3.bf16.msra.mxu0 %v2500_v49  ;;  %v2315_v49 = vpack.c.bf16 %v1291_v47, %v1278_v46  ;;  %v1230_v46 = vld [vmem:[%s3254_s3 + $0xf0] sm:$0xff]  ;;  %v1243_v47 = vld [vmem:[%s3254_s3 + $0x158] sm:$0xff] }
  0x58   :  { %2230 = vmatprep.subr.bf16.mxu0 %v2503_v50  ;;  %v1280_v50 = vld [vmem:[%s3254_s3 + $0x280] sm:$0xff] }
  0x59   :  { %2251 = vmatpush3.bf16.msra.mxu1 %v2502_v51  ;;  %v1293_v51 = vld [vmem:[%s3254_s3 + $0x2e8] sm:$0xff] }
  0x5a   :  { %2252 = vmatprep.subr.bf16.mxu1 %v2505_v52  ;;  %v2331_v52 = vpack.c.bf16 %v1293_v51, %v1280_v50  ;;  %v2353_v51 = vpack.c.bf16 %v1246_v42, %v1233_v41  ;;  %v1236_v41 = vld [vmem:[%s3254_s3 + $0x120] sm:$0xff]  ;;  %v1249_v42 = vld [vmem:[%s3254_s3 + $0x188] sm:$0xff] }
  0x5b   :  { %2231 = vmatpush3.bf16.msra.mxu0 %v2504_v53  ;;  %v1205_v53 = vld [vmem:[%s3254_s3 + $0x28] sm:$0xff] }
  0x5c   :  { %2232 = vmatprep.subr.bf16.mxu0 %v2507_v54  ;;  %v1218_v54 = vld [vmem:[%s3254_s3 + $0x90] sm:$0xff] }
  0x5d   :  { %2253 = vmatpush3.bf16.msra.mxu1 %v2506_v55  ;;  %v1207_v55 = vld [vmem:[%s3254_s3 + $0x38] sm:$0xff] }
  0x5e   :  { %2254 = vmatprep.subr.bf16.mxu1 %v2509_v56  ;;  %v2333_v56 = vpack.c.bf16 %v1218_v54, %v1205_v53  ;;  %v1245_v53 = vld [vmem:[%s3254_s3 + $0x168] sm:$0xff] }
  0x5f   :  { %2233 = vmatpush3.bf16.msra.mxu0 %v2508_v57  ;;  %v1220_v57 = vld [vmem:[%s3254_s3 + $0xa0] sm:$0xff]  ;;  %v1257_v54 = vld [vmem:[%s3254_s3 + $0x1c8] sm:$0xff] }
  0x60   :  { %2274 = vmatprep.subr.bf16.mxu0 %v2514_v62 }
  0x61   :  { %2255 = vmatpush3.bf16.msra.mxu1 %v2510_v59 }
  0x62   :  { %1113 = vmatmul.mubr.bf16.vlgmr.msra.gmra.mrb[8].mxu0 %v299_v58  ;;  %2302 = vmatprep.subr.bf16.mxu1 %v2301_v6  ;;  %v2349_v58 = vpack.c.bf16 %v1220_v57, %v1207_v55  ;;  %v1259_v57 = vld [vmem:[%s3254_s3 + $0x1d8] sm:$0xff] }
  0x63   :  { %2275 = vmatpush3.bf16.msra.mxu0 %v2511_v61  ;;  %2278 = vmatprep.mubr.msk.bf16.mxu0 %vm2515_vm0, %v2514_v62 }
  0x64   :  { %1153 = vmatmul.mubr.bf16.vlgmr.msra.gmra.mrb[8].mxu1 %v314_v63  ;;  %2276 = vmatprep.subr.bf16.mxu0 %v2514_v62 }
  0x65   :  { %1441 = vmatprep.mubr.f32.mxu1 %v2514_v62  ;;  %2304 = vmatpush1.bf16.msra.mxu1 %v2303_v11 }
  0x66   :  { %2306 = vmatprep.subr.bf16.mxu1 %v2305_v19 }
  0x67   :  { %2277 = vmatpush3.bf16.msra.mxu0 %v2512_v1 }
  0x68   :  { %2318 = vmatprep.subr.bf16.mxu0 %v2317_v10 }
  0x69   :  { %2308 = vmatpush1.bf16.msra.mxu1 %v2307_v24 }
  0x6a   :  { %2279 = vmatmul.mubr.msk.bf16.vlgmr.msra.gmra.mrb[12].mxu0 %vm916_vm1, %v306_v2  ;;  %2310 = vmatprep.subr.bf16.mxu1 %v2309_v31 }
  0x6b   :  { %1512 = vmatprep.mubr.f32.mxu0 %v2514_v62  ;;  %2320 = vmatpush1.bf16.msra.mxu0 %v2319_v15 }
  0x6c   :  { %2322 = vmatprep.subr.bf16.mxu0 %v2321_v20 }
  0x6d   :  { %2312 = vmatpush1.bf16.msra.mxu1 %v2311_v37  ;;  %v1219_v37 = vld [vmem:[%s3254_s3 + $0x98] sm:$0xff] }
  0x6e   :  { %2314 = vmatprep.subr.bf16.mxu1 %v2313_v44  ;;  %v2335_v44 = vpack.c.bf16 %v1217_v33, %v1204_v32  ;;  %v1237_v32 = vld [vmem:[%s3254_s3 + $0x128] sm:$0xff]  ;;  %v1250_v33 = vld [vmem:[%s3254_s3 + $0x190] sm:$0xff] }
  0x6f   :  { %2324 = vmatpush1.bf16.msra.mxu0 %v2323_v26 }
  0x70   :  { %2326 = vmatprep.subr.bf16.mxu0 %v2325_v36  ;;  %v1206_v36 = vld [vmem:[%s3254_s3 + $0x30] sm:$0xff] }
  0x71   :  { %2316 = vmatpush1.bf16.msra.mxu1 %v2315_v49  ;;  %v2351_v45 = vpack.c.bf16 %v1219_v37, %v1206_v36  ;;  %v1234_v37 = vld [vmem:[%s3254_s3 + $0x110] sm:$0xff] }
  0x72   :  { %2334 = vmatprep.subr.bf16.mxu1 %v2333_v56  ;;  %v1270_v56 = vld [vmem:[%s3254_s3 + $0x230] sm:$0xff] }
  0x73   :  { %2328 = vmatpush1.bf16.msra.mxu0 %v2327_v40  ;;  %v1244_v40 = vld [vmem:[%s3254_s3 + $0x160] sm:$0xff] }
  0x74   :  { %2330 = vmatprep.subr.bf16.mxu0 %v2329_v48  ;;  %v2337_v50 = vpack.c.bf16 %v1244_v40, %v1231_v38  ;;  %v1247_v38 = vld [vmem:[%s3254_s3 + $0x178] sm:$0xff]  ;;  %v2385_v40 = vpack.c.bf16 %v1250_v33, %v1237_v32 }
  0x77   :  { %2332 = vmatpush1.bf16.msra.mxu0 %v2331_v52  ;;  %v1232_v52 = vld [vmem:[%s3254_s3 + $0x100] sm:$0xff] }
  0x78   :  { %2350 = vmatprep.subr.bf16.mxu0 %v2349_v58  ;;  %v1272_v58 = vld [vmem:[%s3254_s3 + $0x240] sm:$0xff] }
  0xf5   :  { %v2146_v59 = vpop.f32.mrb[0].mxu0 }
  0xf6   :  { %v2147_v61 = vpop.f32.mrb[1].mxu0 }
  0xf7   :  { %v2148_v63 = vadd.f32 %v2147_v61, %v2146_v59  ;;  %v2149_v0 = vpop.f32.mrb[2].mxu0  ;;  %v2168_v1 = vpop.f32.mrb[0].mxu1  ;;  %v2355_v61 = vpack.c.bf16 %v1245_v53, %v1232_v52 }
  0xf8   :  { %v2150_v2 = vpop.f32.mrb[3].mxu0  ;;  %v2169_v3 = vpop.f32.mrb[1].mxu1  ;;  %v1269_v0 = vld [vmem:[%s3254_s3 + $0x228] sm:$0xff] }
  0xf9   :  { %v955_v4 = vadd.f32 %v2148_v63, %v2017_v60  ;;  %v2170_v5 = vadd.f32 %v2169_v3, %v2168_v1  ;;  %v2171_v6 = vpop.f32.mrb[2].mxu1  ;;  %v2339_v60 = vpack.c.bf16 %v1243_v47, %v1230_v46  ;;  %v1256_v63 = vld [vmem:[%s3254_s3 + $0x1c0] sm:$0xff]  ;;  %v2341_v1 = vpack.c.bf16 %v1270_v56, %v1257_v54  ;;  %v1258_v3 = vld [vmem:[%s3254_s3 + $0x1d0] sm:$0xff]  ;;  %v1287_v56 = vld [vmem:[%s3254_s3 + $0x2b8] sm:$0xff] }
  0xfa   :  { %v2172_v7 = vpop.f32.mrb[3].mxu1  ;;  %v2357_v2 = vpack.c.bf16 %v1272_v58, %v1259_v57  ;;  %v1296_v6 = vld [vmem:[%s3254_s3 + $0x300] sm:$0xff]  ;;  %v2371_v47 = vpack.c.bf16 %v1247_v38, %v1234_v37  ;;  %v1262_v54 = vld [vmem:[%s3254_s3 + $0x1f0] sm:$0xff]  ;;  %v1289_v58 = vld [vmem:[%s3254_s3 + $0x2c8] sm:$0xff] }
  0xfb   :  { %v995_v8 = vadd.f32 %v2170_v5, %v955_v4  ;;  %v1271_v4 = vld [vmem:[%s3254_s3 + $0x238] sm:$0xff]  ;;  %v1285_v7 = vld [vmem:[%s3254_s3 + $0x2a8] sm:$0xff]  ;;  %v1276_v46 = vld [vmem:[%s3254_s3 + $0x260] sm:$0xff] }
  0xfc   :  { %v1283_v5 = vld [vmem:[%s3254_s3 + $0x298] sm:$0xff]  ;;  %v1300_v57 = vld [vmem:[%s3254_s3 + $0x320] sm:$0xff] }
 0x115   :  { %v2190_v9 = vpop.f32.mrb[4].mxu0 }
 0x116   :  { %v2191_v10 = vpop.f32.mrb[5].mxu0 }
 0x117   :  { %v2192_v11 = vadd.f32 %v2191_v10, %v2190_v9  ;;  %v2193_v12 = vpop.f32.mrb[6].mxu0  ;;  %v2212_v13 = vpop.f32.mrb[4].mxu1  ;;  %v2343_v9 = vpack.c.bf16 %v1269_v0, %v1256_v63  ;;  %v2359_v10 = vpack.c.bf16 %v1271_v4, %v1258_v3  ;;  %v1286_v63 = vld [vmem:[%s3254_s3 + $0x2b0] sm:$0xff]  ;;  %v2377_v0 = vpack.c.bf16 %v1300_v57, %v1287_v56  ;;  %v1288_v3 = vld [vmem:[%s3254_s3 + $0x2c0] sm:$0xff]  ;;  %v1301_v4 = vld [vmem:[%s3254_s3 + $0x328] sm:$0xff] }
 0x118   :  { %v2194_v14 = vpop.f32.mrb[7].mxu0  ;;  %v2213_v15 = vpop.f32.mrb[5].mxu1  ;;  %v1295_v12 = vld [vmem:[%s3254_s3 + $0x2f8] sm:$0xff] }
 0x119   :  { %v1035_v16 = vadd.f32 %v2192_v11, %v995_v8  ;;  %v2214_v17 = vadd.f32 %v2213_v15, %v2212_v13  ;;  %v2215_v18 = vpop.f32.mrb[6].mxu1  ;;  %v1298_v8 = vld [vmem:[%s3254_s3 + $0x310] sm:$0xff]  ;;  %v2345_v13 = vpack.c.bf16 %v1296_v6, %v1283_v5  ;;  %v1284_v15 = vld [vmem:[%s3254_s3 + $0x2a0] sm:$0xff]  ;;  %v2395_v6 = vpack.c.bf16 %v1301_v4, %v1288_v3 }
 0x11a   :  { %v2216_v19 = vpop.f32.mrb[7].mxu1  ;;  %v1282_v11 = vld [vmem:[%s3254_s3 + $0x290] sm:$0xff]  ;;  %v2361_v14 = vpack.c.bf16 %v1298_v8, %v1285_v7  ;;  %v1212_v7 = vld [vmem:[%s3254_s3 + $0x60] sm:$0xff]  ;;  %v1225_v8 = vld [vmem:[%s3254_s3 + $0xc8] sm:$0xff] }
 0x11b   :  { %v1075_v20 = vadd.f32 %v2214_v17, %v1035_v16  ;;  %v1297_v16 = vld [vmem:[%s3254_s3 + $0x308] sm:$0xff]  ;;  %v1222_v18 = vld [vmem:[%s3254_s3 + $0xb0] sm:$0xff]  ;;  %v1211_v19 = vld [vmem:[%s3254_s3 + $0x58] sm:$0xff] }
 0x11c   :  { %v1209_v17 = vld [vmem:[%s3254_s3 + $0x48] sm:$0xff] }
 0x135   :  { %v2234_v21 = vpop.f32.mrb[8].mxu0 }
 0x136   :  { %v2235_v22 = vpop.f32.mrb[9].mxu0 }
 0x137   :  { %v2236_v23 = vadd.f32 %v2235_v22, %v2234_v21  ;;  %v2256_v24 = vpop.f32.mrb[8].mxu1  ;;  %v2237_v25 = vpop.f32.mrb[10].mxu0  ;;  %v2347_v21 = vpack.c.bf16 %v1295_v12, %v1282_v11  ;;  %v2363_v22 = vpack.c.bf16 %v1297_v16, %v1284_v15  ;;  %v1238_v11 = vld [vmem:[%s3254_s3 + $0x130] sm:$0xff]  ;;  %v1251_v12 = vld [vmem:[%s3254_s3 + $0x198] sm:$0xff]  ;;  %v1277_v15 = vld [vmem:[%s3254_s3 + $0x268] sm:$0xff] }
 0x138   :  { %v2257_v26 = vpop.f32.mrb[9].mxu1  ;;  %v2238_v27 = vpop.f32.mrb[11].mxu0  ;;  %v2365_v25 = vpack.c.bf16 %v1222_v18, %v1209_v17  ;;  %v1290_v17 = vld [vmem:[%s3254_s3 + $0x2d0] sm:$0xff] }
 0x139   :  { %v1115_v28 = vadd.f32 %v2236_v23, %v1075_v20  ;;  %v2258_v29 = vadd.f32 %v2257_v26, %v2256_v24  ;;  %v2259_v31 = vpop.f32.mrb[10].mxu1  ;;  %v1224_v20 = vld [vmem:[%s3254_s3 + $0xc0] sm:$0xff]  ;;  %v1221_v24 = vld [vmem:[%s3254_s3 + $0xa8] sm:$0xff]  ;;  %v1210_v27 = vld [vmem:[%s3254_s3 + $0x50] sm:$0xff] }
 0x13a   :  { %v2260_v34 = vpop.f32.mrb[11].mxu1  ;;  %v1208_v23 = vld [vmem:[%s3254_s3 + $0x40] sm:$0xff]  ;;  %v2381_v26 = vpack.c.bf16 %v1224_v20, %v1211_v19  ;;  %v1310_v19 = vsub.s32 0, %v2625_v30  ;;  %v1318_v20 = vsub.s32 2, %v2625_v30 }
 0x13b   :  { %v1155_v39 = vadd.f32 %v2258_v29, %v1115_v28  ;;  %v1223_v28 = vld [vmem:[%s3254_s3 + $0xb8] sm:$0xff]  ;;  %v1248_v31 = vld [vmem:[%s3254_s3 + $0x180] sm:$0xff]  ;;  %v2367_v34 = vpack.c.bf16 %v1221_v24, %v1208_v23  ;;  %v1322_v23 = vsub.s32 3, %v2625_v30 }
 0x13c   :  { %v1235_v29 = vld [vmem:[%s3254_s3 + $0x118] sm:$0xff]  ;;  %v2383_v36 = vpack.c.bf16 %v1223_v28, %v1210_v27 }
 0x13d   :  { %v1194_v43 = vpop.f32.mrb[12].mxu0 }
 0x13e   :  { %v3025_v48 = vadd.f32 %v1194_v43, %v1155_v39  ;;  %v2280_v49 = vpop.f32.mrb[13].mxu0  ;;  %v2369_v39 = vpack.c.bf16 %v1248_v31, %v1235_v29  ;;  %v1261_v43 = vld [vmem:[%s3254_s3 + $0x1e8] sm:$0xff] }
 0x13f   :  { %v1197_v55 = vpop.f32.mrb[14].mxu0  ;;  %v2387_v49 = vpack.c.bf16 %v1249_v42, %v1236_v41 }
 0x140   :  { %v2281_v59 = vpop.f32.mrb[15].mxu0  ;;  %2117 = vmatmul.mubr.msk.f32.vlgmr.msra.gmra.mrb[12].mxu1 %vm1373_vm2, %v3025_v48  ;;  %2118 = vmatmul.mubr.msk.f32.vlgmr.msra.gmra.mrb[16].mxu0 %vm1373_vm2, %v3025_v48  ;;  %v1275_v55 = vld [vmem:[%s3254_s3 + $0x258] sm:$0xff] }
 0x141   :  { %2336 = vmatpush1.bf16.msra.mxu1 %v2335_v44  ;;  %2352 = vmatpush1.bf16.msra.mxu0 %v2351_v45  ;;  %v1274_v44 = vld [vmem:[%s3254_s3 + $0x250] sm:$0xff]  ;;  %v1263_v45 = vld [vmem:[%s3254_s3 + $0x1f8] sm:$0xff] }
 0x142   :  { %2338 = vmatprep.subr.bf16.mxu1 %v2337_v50  ;;  %2354 = vmatprep.subr.bf16.mxu0 %v2353_v51  ;;  %v1260_v50 = vld [vmem:[%s3254_s3 + $0x1e0] sm:$0xff]  ;;  %v1273_v51 = vld [vmem:[%s3254_s3 + $0x248] sm:$0xff]  ;;  %v2373_v52 = vpack.c.bf16 %v1274_v44, %v1261_v43  ;;  %v2389_v53 = vpack.c.bf16 %v1276_v46, %v1263_v45  ;;  %v1302_v59 = vld [vmem:[%s3254_s3 + $0x330] sm:$0xff]  ;;  %v1326_v45 = vsub.s32 4, %v2625_v30  ;;  %v1334_v46 = vsub.s32 6, %v2625_v30 }
 0x143   :  { %1583 = vmatprep.mubr.f32.mxu1 %v2514_v62  ;;  %1654 = vmatprep.mubr.f32.mxu0 %v2514_v62 }
 0x145   :  { %2340 = vmatpush1.bf16.msra.mxu1 %v2339_v60  ;;  %2356 = vmatpush1.bf16.msra.mxu0 %v2355_v61  ;;  %v2375_v60 = vpack.c.bf16 %v1273_v51, %v1260_v50  ;;  %v2391_v61 = vpack.c.bf16 %v1275_v55, %v1262_v54  ;;  %v1338_v50 = vsub.s32 7, %v2625_v30 }
 0x146   :  { %2342 = vmatprep.subr.bf16.mxu1 %v2341_v1  ;;  %2358 = vmatprep.subr.bf16.mxu0 %v2357_v2  ;;  %v2393_v1 = vpack.c.bf16 %v1302_v59, %v1289_v58  ;;  %v1299_v2 = vld [vmem:[%s3254_s3 + $0x318] sm:$0xff] }
 0x147   :  { %v2379_v5 = vpack.c.bf16 %v1299_v2, %v1286_v63 }
 0x149   :  { %2344 = vmatpush1.bf16.msra.mxu1 %v2343_v9  ;;  %2360 = vmatpush1.bf16.msra.mxu0 %v2359_v10  ;;  %v2398_v9 = vpack.c.bf16 %v1225_v8, %v1212_v7  ;;  %v2516_v10 = vmov 0.0|0.0   ;;  %v1305_v8 = vld [vmem:[%s3256_s4 + $0x8] sm:$0x1f] }
 0x14a   :  { %2346 = vmatprep.subr.bf16.mxu1 %v2345_v13  ;;  %2362 = vmatprep.subr.bf16.mxu0 %v2361_v14  ;;  %v2401_v13 = vpack.c.bf16 %v1251_v12, %v1238_v11  ;;  %v1264_v14 = vld [vmem:[%s3254_s3 + $0x200] sm:$0xff]  ;;  %v1343_v11 = vrot.slane %v1305_v8, %v1310_v19  ;;  %v1351_v12 = vrot.slane %v1305_v8, %v1318_v20 }
 0x14b   :  { %v2404_v16 = vpack.c.bf16 %v1277_v15, %v1264_v14  ;;  %v1355_v15 = vrot.slane %v1305_v8, %v1322_v23 }
 0x14d   :  { %2348 = vmatpush1.bf16.msra.mxu1 %v2347_v21  ;;  %2364 = vmatpush1.bf16.msra.mxu0 %v2363_v22  ;;  %v1304_v21 = vld [vmem:[%s3256_s4] sm:$0xff]  ;;  %v1314_v22 = vsub.s32 1, %v2625_v30 }
 0x14e   :  { %2366 = vmatprep.subr.bf16.mxu1 %v2365_v25  ;;  %2382 = vmatprep.subr.bf16.mxu0 %v2381_v26  ;;  %v1311_v24 = vrot.slane %v1304_v21, %v1310_v19  ;;  %v1319_v25 = vrot.slane %v1304_v21, %v1318_v20  ;;  %v1323_v27 = vrot.slane %v1304_v21, %v1322_v23 }
 0x14f   :  { %v1315_v26 = vrot.slane %v1304_v21, %v1314_v22  ;;  %v1327_v51 = vrot.slane %v1304_v21, %v1326_v45  ;;  %v1339_v54 = vrot.slane %v1304_v21, %v1338_v50  ;;  %v1347_v14 = vrot.slane %v1305_v8, %v1314_v22 }
 0x150   :  { %2119 = vmatmul.mubr.msk.f32.vlgmr.msra.gmra.mrb[14].mxu1 %vm1373_vm2, %v3025_v48  ;;  %2120 = vmatmul.mubr.msk.f32.vlgmr.msra.gmra.mrb[18].mxu0 %vm1373_vm2, %v3025_v48 }
 0x151   :  { %2368 = vmatpush1.bf16.msra.mxu1 %v2367_v34  ;;  %2384 = vmatpush1.bf16.msra.mxu0 %v2383_v36 }
 0x152   :  { %2370 = vmatprep.subr.bf16.mxu1 %v2369_v39  ;;  %2386 = vmatprep.subr.bf16.mxu0 %v2385_v40 }
 0x153   :  { %1725 = vmatprep.mubr.f32.mxu1 %v2514_v62  ;;  %1796 = vmatprep.mubr.f32.mxu0 %v2514_v62 }
 0x155   :  { %2372 = vmatpush1.bf16.msra.mxu1 %v2371_v47  ;;  %2388 = vmatpush1.bf16.msra.mxu0 %v2387_v49  ;;  %v1330_v49 = vsub.s32 5, %v2625_v30 }
 0x156   :  { %2374 = vmatprep.subr.bf16.mxu1 %v2373_v52  ;;  %2390 = vmatprep.subr.bf16.mxu0 %v2389_v53  ;;  %v1335_v52 = vrot.slane %v1304_v21, %v1334_v46 }
 0x157   :  { %v1331_v53 = vrot.slane %v1304_v21, %v1330_v49 }
 0x159   :  { %2376 = vmatpush1.bf16.msra.mxu1 %v2375_v60  ;;  %2392 = vmatpush1.bf16.msra.mxu0 %v2391_v61 }
 0x15a   :  { %2378 = vmatprep.subr.bf16.mxu1 %v2377_v0  ;;  %2394 = vmatprep.subr.bf16.mxu0 %v2393_v1 }
 0x15d   :  { %2380 = vmatpush1.bf16.msra.mxu1 %v2379_v5  ;;  %2396 = vmatpush1.bf16.msra.mxu0 %v2395_v6 }
 0x15e   :  { %2397 = vmatprep.subr.bf16.mxu1 %v2516_v10 }
 0x160   :  { %2121 = vmatmul.mubr.msk.f32.vlgmr.msra.gmra.mrb[16].mxu1 %vm1373_vm2, %v3025_v48  ;;  %2122 = vmatmul.mubr.msk.f32.vlgmr.msra.gmra.mrb[20].mxu0 %vm1373_vm2, %v3025_v48 }
 0x161   :  { %2399 = vmatpush3.bf16.msra.mxu1 %v2398_v9  ;;  %2298 = vmatprep.mubr.msk.f32.mxu1 %vm2515_vm0, %v2514_v62  ;;  %v1303_v62 = vld [vmem:[%s3254_s3 + $0x338] sm:$0xff] }
 0x162   :  { %2400 = vmatprep.subr.bf16.mxu1 %v2516_v10  ;;  %v2407_v18 = vpack.c.bf16 %v1303_v62, %v1290_v17 }
 0x165   :  { %2402 = vmatpush3.bf16.msra.mxu1 %v2401_v13 }
 0x166   :  { %2403 = vmatprep.subr.bf16.mxu1 %v2516_v10 }
 0x169   :  { %2405 = vmatpush3.bf16.msra.mxu1 %v2404_v16 }
 0x16a   :  { %2406 = vmatprep.subr.bf16.mxu1 %v2516_v10 }
 0x16d   :  { %2408 = vmatpush3.bf16.msra.mxu1 %v2407_v18 }
 0x170   :  { %2299 = vmatmul.mubr.msk.f32.vlgmr.msra.gmra.mrb[18].mxu1 %vm1373_vm2, %v3025_v48 }
 0x213   :  { %v1443_v28 = vpop.f32.mrb[12].mxu1  ;;  %v1514_v29 = vpop.f32.mrb[16].mxu0 }
 0x214   :  { %v1444_v31 = vadd.f32 %v1443_v28, %v1311_v24  ;;  %v1515_v48 = vadd.f32 %v1514_v29, %v1319_v25  ;;  %v1445_v32 = vpop.f32.mrb[13].mxu1  ;;  %v1516_v33 = vpop.f32.mrb[17].mxu0 }
 0x215   :  { %v1446_v34 = vadd.f32 %v1445_v32, %v1315_v26  ;;  %v1517_v36 = vadd.f32 %v1516_v33, %v1323_v27  ;;  %v1359_v32 = vrot.slane %v1305_v8, %v1326_v45 }
 0x216   :  { %v1873_v37 = vmax.f32 %v1444_v31, 0.0  ;;  %v1875_v38 = vmax.f32 %v1515_v48, 0.0 }
 0x217   :  { %v1874_v39 = vmax.f32 %v1446_v34, 0.0  ;;  %v1876_v40 = vmax.f32 %v1517_v36, 0.0 }
 0x219   :  { %v2124_v41 = vpack.c.bf16 %v1874_v39, %v1873_v37  ;;  %v2125_v42 = vpack.c.bf16 %v1876_v40, %v1875_v38 }
 0x21b   :  { %v1922_v43 = vrot.slane %v2124_v41, %v2640_v35  ;;  %v1929_v44 = vrot.slane %v2125_v42, %v2640_v35 }
 0x21d   :  { %v1944_v47 = vcombine.low %v1922_v43, %v1929_v44 }
 0x21f   :  { %v1952_v9 = vrot.slane %v1944_v47, %v2640_v35 }
 0x223   :  { %v1585_v55 = vpop.f32.mrb[14].mxu1  ;;  %v1656_v56 = vpop.f32.mrb[18].mxu0 }
 0x224   :  { %v1586_v57 = vadd.f32 %v1585_v55, %v1327_v51  ;;  %v1657_v58 = vadd.f32 %v1656_v56, %v1335_v52  ;;  %v1587_v59 = vpop.f32.mrb[15].mxu1  ;;  %v1658_v60 = vpop.f32.mrb[19].mxu0 }
 0x225   :  { %v1588_v61 = vadd.f32 %v1587_v59, %v1331_v53  ;;  %v1659_v63 = vadd.f32 %v1658_v60, %v1339_v54 }
 0x226   :  { %v1877_v0 = vmax.f32 %v1586_v57, 0.0  ;;  %v1879_v1 = vmax.f32 %v1657_v58, 0.0 }
 0x227   :  { %v1878_v2 = vmax.f32 %v1588_v61, 0.0  ;;  %v1880_v3 = vmax.f32 %v1659_v63, 0.0 }
 0x229   :  { %v2126_v4 = vpack.c.bf16 %v1878_v2, %v1877_v0  ;;  %v2127_v5 = vpack.c.bf16 %v1880_v3, %v1879_v1 }
 0x22b   :  { %v1936_v30 = vrot.slane %v2126_v4, %v2640_v35  ;;  %v1943_v6 = vrot.slane %v2127_v5, %v2640_v35 }
 0x22d   :  { %v1945_v7 = vcombine.low %v1936_v30, %v1943_v6 }
 0x22f   :  { %v1959_v10 = vrot.slane %v1945_v7, %v2640_v35 }
 0x231   :  { %v1960_v13 = vcombine.low %v1952_v9, %v1959_v10 }
 0x233   :  { %2002 = vst [vmem:[%s3257_s5] sm:$0xff] %v1960_v13  ;;  %v1727_v16 = vpop.f32.mrb[16].mxu1  ;;  %v1798_v17 = vpop.f32.mrb[20].mxu0 }
 0x234   :  { %v1728_v62 = vadd.f32 %v1727_v16, %v1343_v11  ;;  %v1799_v18 = vadd.f32 %v1798_v17, %v1351_v12  ;;  %v1729_v21 = vpop.f32.mrb[17].mxu1  ;;  %v1800_v24 = vpop.f32.mrb[21].mxu0 }
 0x235   :  { %v1730_v25 = vadd.f32 %v1729_v21, %v1347_v14  ;;  %v1801_v26 = vadd.f32 %v1800_v24, %v1355_v15 }
 0x236   :  { %v1881_v27 = vmax.f32 %v1728_v62, 0.0  ;;  %v1883_v28 = vmax.f32 %v1799_v18, 0.0 }
 0x237   :  { %v1882_v29 = vmax.f32 %v1730_v25, 0.0  ;;  %v1884_v19 = vmax.f32 %v1801_v26, 0.0 }
 0x239   :  { %v2128_v20 = vpack.c.bf16 %v1882_v29, %v1881_v27  ;;  %v2129_v31 = vpack.c.bf16 %v1884_v19, %v1883_v28 }
 0x23b   :  { %v1969_v22 = vrot.slane %v2128_v20, %v2640_v35  ;;  %v1976_v23 = vrot.slane %v2129_v31, %v2640_v35 }
 0x23d   :  { %v1984_v48 = vcombine.low %v1969_v22, %v1976_v23 }
 0x23f   :  { %v1991_v40 = vrot.slane %v1984_v48, %v2640_v35 }
 0x243   :  { %v1869_v33 = vpop.f32.mrb[18].mxu1 }
 0x244   :  { %v1870_v34 = vadd.f32 %v1869_v33, %v1359_v32  ;;  %v2300_v36 = vpop.f32.mrb[19].mxu1 }
 0x246   :  { %v1885_v37 = vmax.f32 %v1870_v34, 0.0 }
 0x248   :  { %v1898_v38 = vpack.c.bf16 %v1885_v37, %v1885_v37 }
 0x24a   :  { %v1983_v39 = vrot.slane %v1898_v38, %v2640_v35 }
 0x24c   :  { %v1998_v41 = vrot.slane %v1983_v39, %v2640_v35 }
 0x24e   :  { %v1999_v42 = vcombine.low %v1991_v40, %v1998_v41 }
 0x250   :  { %2012 = vst.msk [vmem:[%s3257_s5 + $0x8] sm:$0x1f] %vm2011_vm11, %v1999_v42 }

// kernel: conv_autoencoder_forward.8
= control target key start
LH: loop header
LB: loop body
LE: loop exit
PB: predicated region body
PF: predicated region fallthrough
CT: control target
= control target key end

     0   :  { %v372_v1 = vmov 0   ;;  %vm264_vm0 = vcmask 797696   ;;  %s485_s1 = inlined_call_operand.vmem [shape: bf16[128,98], index: 1, kind: input, shape index: {}]   ;;  %s486_s0 = inlined_call_operand.vmem [shape: bf16[64,128], index: 0, kind: input, shape index: {}]   ;;  %s487_s2 = inlined_call_operand.vmem [shape: f32[64,1], index: 2, kind: input, shape index: {}]   ;;  %s488_s3 = inlined_call_operand.vmem [shape: bf16[64,98], index: 3, kind: output, shape index: {}]  }
   0x1   :  { %v360_v0 = vld [vmem:[%s485_s1] sm:$0xff]   ;;  %359 = vset.pattern.permute.xlu1 %v372_v1  ;;  %358 = vset.pattern.permute.xlu0 %v372_v1  ;;  %v361_v2 = vld [vmem:[%s485_s1 + $0x8] sm:$0xff]   ;;  %v362_v3 = vld [vmem:[%s485_s1 + $0x10] sm:$0xff]  }
   0x2   :  { %317 = vmatprep.subr.bf16.mxu0 %v360_v0  ;;  %341 = vmatprep.subr.bf16.mxu1 %v360_v0  ;;  %v363_v4 = vld [vmem:[%s485_s1 + $0x18] sm:$0xff]   ;;  %v368_v5 = vld [vmem:[%s486_s0] sm:$0xff]   ;;  %v369_v6 = vld [vmem:[%s486_s0 + $0x10] sm:$0xff]  }
   0x3   :  { %318 = vmatpush3.bf16.msra.mxu0 %v360_v0  ;;  %349 = vmatpush3.bf16.msra.mxu1 %v360_v0  ;;  %v364_v7 = vld [vmem:[%s485_s1 + $0x20] sm:$0xff]   ;;  %v41_v8 = vld [vmem:[%s487_s2 + $0x10] sm:$0xff]  ;;  %v42_v10 = vld [vmem:[%s487_s2 + $0x18] sm:$0xff] }
   0x4   :  { %319 = vmatprep.subr.bf16.mxu0 %v361_v2  ;;  %342 = vmatprep.subr.bf16.mxu1 %v361_v2  ;;  %v39_v9 = vld [vmem:[%s487_s2] sm:$0xff]  ;;  %v40_v11 = vld [vmem:[%s487_s2 + $0x8] sm:$0xff]  ;;  %v366_v15 = vld [vmem:[%s485_s1 + $0x30] sm:$0xff]  }
   0x5   :  { %333 = vmatprep.mubr.bf16.mxu0 %v368_v5  ;;  %337 = vmatprep.mubr.bf16.mxu1 %v369_v6  ;;  %v365_v12 = vld [vmem:[%s485_s1 + $0x28] sm:$0xff]   ;;  %v43_v14 = vld [vmem:[%s487_s2 + $0x20] sm:$0xff]  ;;  %v46_v16 = vld [vmem:[%s487_s2 + $0x38] sm:$0xff] }
   0x6   :  { %59 = vperm.xlu1 %359, %v41_v8   ;;  %49 = vperm.xlu0 %358, %v39_v9   ;;  %v44_v13 = vld [vmem:[%s487_s2 + $0x28] sm:$0xff]  ;;  %v45_v17 = vld [vmem:[%s487_s2 + $0x30] sm:$0xff]  ;;  %v367_v18 = vld [vmem:[%s485_s1 + $0x38] sm:$0xff]  }
   0x7   :  { %320 = vmatpush3.bf16.msra.mxu0 %v361_v2  ;;  %350 = vmatpush3.bf16.msra.mxu1 %v361_v2  ;;  %v370_v19 = vld [vmem:[%s486_s0 + $0x8] sm:$0xff]   ;;  %v371_v20 = vld [vmem:[%s486_s0 + $0x18] sm:$0xff]  }
   0x8   :  { %321 = vmatprep.subr.bf16.mxu0 %v362_v3  ;;  %343 = vmatprep.subr.bf16.mxu1 %v362_v3 }
   0xa   :  { %64 = vperm.xlu1 %359, %v42_v10   ;;  %54 = vperm.xlu0 %358, %v40_v11  }
   0xb   :  { %322 = vmatpush3.bf16.msra.mxu0 %v362_v3  ;;  %351 = vmatpush3.bf16.msra.mxu1 %v362_v3 }
   0xc   :  { %323 = vmatprep.subr.bf16.mxu0 %v363_v4  ;;  %344 = vmatprep.subr.bf16.mxu1 %v363_v4 }
   0xe   :  { %74 = vperm.xlu1 %359, %v44_v13   ;;  %69 = vperm.xlu0 %358, %v43_v14  }
   0xf   :  { %324 = vmatpush3.bf16.msra.mxu0 %v363_v4  ;;  %352 = vmatpush3.bf16.msra.mxu1 %v363_v4 }
  0x10   :  { %325 = vmatprep.subr.bf16.mxu0 %v364_v7  ;;  %345 = vmatprep.subr.bf16.mxu1 %v364_v7 }
  0x12   :  { %84 = vperm.xlu1 %359, %v46_v16   ;;  %79 = vperm.xlu0 %358, %v45_v17  }
  0x13   :  { %326 = vmatpush3.bf16.msra.mxu0 %v364_v7  ;;  %353 = vmatpush3.bf16.msra.mxu1 %v364_v7 }
  0x14   :  { %327 = vmatprep.subr.bf16.mxu0 %v365_v12  ;;  %346 = vmatprep.subr.bf16.mxu1 %v365_v12 }
  0x17   :  { %328 = vmatpush3.bf16.msra.mxu0 %v365_v12  ;;  %354 = vmatpush3.bf16.msra.mxu1 %v365_v12 }
  0x18   :  { %329 = vmatprep.subr.bf16.mxu0 %v366_v15  ;;  %347 = vmatprep.subr.bf16.mxu1 %v366_v15 }
  0x1b   :  { %330 = vmatpush3.bf16.msra.mxu0 %v366_v15  ;;  %355 = vmatpush3.bf16.msra.mxu1 %v366_v15 }
  0x1c   :  { %331 = vmatprep.subr.bf16.mxu0 %v367_v18  ;;  %348 = vmatprep.subr.bf16.mxu1 %v367_v18 }
  0x1f   :  { %332 = vmatpush3.bf16.msra.mxu0 %v367_v18  ;;  %356 = vmatpush3.bf16.msra.mxu1 %v367_v18 }
  0x22   :  { %334 = vmatmul.mubr.bf16.vlgmr.msra.gmra.mrb[0].mxu0 %v370_v19  ;;  %338 = vmatmul.mubr.bf16.vlgmr.msra.gmra.mrb[0].mxu1 %v371_v20 }
  0x85   :  { %v60_v21 = vpop.permute.xlu1 %59  ;;  %v50_v22 = vpop.permute.xlu0 %49 }
  0x89   :  { %v65_v23 = vpop.permute.xlu1 %64  ;;  %v55_v24 = vpop.permute.xlu0 %54 }
  0x8d   :  { %v75_v25 = vpop.permute.xlu1 %74  ;;  %v70_v26 = vpop.permute.xlu0 %69 }
  0x91   :  { %v85_v27 = vpop.permute.xlu1 %84  ;;  %v80_v28 = vpop.permute.xlu0 %79 }
  0xf5   :  { %v335_v29 = vpop.f32.mrb[0].mxu0  ;;  %v339_v30 = vpop.f32.mrb[0].mxu1 }
  0xf6   :  { %v202_v31 = vadd.f32 %v335_v29, %v60_v21  ;;  %v218_v32 = vadd.f32 %v339_v30, %v80_v28  ;;  %v193_v33 = vpop.f32.mrb[1].mxu0  ;;  %v209_v34 = vpop.f32.mrb[1].mxu1 }
  0xf7   :  { %v194_v35 = vadd.f32 %v193_v33, %v50_v22  ;;  %v210_v36 = vadd.f32 %v209_v34, %v70_v26  ;;  %v336_v37 = vpop.f32.mrb[2].mxu0  ;;  %v340_v38 = vpop.f32.mrb[2].mxu1 }
  0xf8   :  { %v226_v39 = vmax.f32 %v202_v31, 0.0  ;;  %v230_v40 = vmax.f32 %v218_v32, 0.0  ;;  %v205_v41 = vadd.f32 %v336_v37, %v65_v23  ;;  %v221_v42 = vadd.f32 %v340_v38, %v85_v27  ;;  %v196_v43 = vpop.f32.mrb[3].mxu0  ;;  %v212_v44 = vpop.f32.mrb[3].mxu1 }
  0xf9   :  { %v224_v45 = vmax.f32 %v194_v35, 0.0  ;;  %v228_v46 = vmax.f32 %v210_v36, 0.0  ;;  %v197_v47 = vadd.f32 %v196_v43, %v55_v24  ;;  %v213_v48 = vadd.f32 %v212_v44, %v75_v25 }
  0xfa   :  { %v299_v49 = vpack.c.bf16 %v226_v39, %v226_v39  ;;  %v303_v50 = vpack.c.bf16 %v230_v40, %v230_v40  ;;  %v227_v51 = vmax.f32 %v205_v41, 0.0  ;;  %v231_v52 = vmax.f32 %v221_v42, 0.0 }
  0xfb   :  { %v297_v53 = vpack.c.bf16 %v224_v45, %v224_v45  ;;  %v301_v54 = vpack.c.bf16 %v228_v46, %v228_v46  ;;  %v225_v55 = vmax.f32 %v197_v47, 0.0  ;;  %v229_v56 = vmax.f32 %v213_v48, 0.0 }
  0xfc   :  { %267 = vst.msk [vmem:[%s488_s3 + $0x8] sm:$0xf] %vm264_vm0, %v299_v49  ;;  %271 = vst.msk [vmem:[%s488_s3 + $0x18] sm:$0xf] %vm264_vm0, %v303_v50  ;;  %v300_v57 = vpack.c.bf16 %v227_v51, %v227_v51  ;;  %v304_v58 = vpack.c.bf16 %v231_v52, %v231_v52 }
  0xfd   :  { %265 = vst.msk [vmem:[%s488_s3] sm:$0xf] %vm264_vm0, %v297_v53  ;;  %269 = vst.msk [vmem:[%s488_s3 + $0x10] sm:$0xf] %vm264_vm0, %v301_v54  ;;  %v298_v59 = vpack.c.bf16 %v225_v55, %v225_v55  ;;  %v302_v60 = vpack.c.bf16 %v229_v56, %v229_v56 }
  0xfe   :  { %268 = vst.msk [vmem:[%s488_s3 + $0xc] sm:$0xf] %vm264_vm0, %v300_v57  ;;  %272 = vst.msk [vmem:[%s488_s3 + $0x1c] sm:$0xf] %vm264_vm0, %v304_v58 }
  0xff   :  { %266 = vst.msk [vmem:[%s488_s3 + $0x4] sm:$0xf] %vm264_vm0, %v298_v59  ;;  %270 = vst.msk [vmem:[%s488_s3 + $0x14] sm:$0xf] %vm264_vm0, %v302_v60 }

// kernel: conv_autoencoder_forward.9
= control target key start
LH: loop header
LB: loop body
LE: loop exit
PB: predicated region body
PF: predicated region fallthrough
CT: control target
= control target key end

     0   :  { %v277_v1 = vmov 0   ;;  %vm118_vm0 = vcmask 523264   ;;  %vm217_vm1 = vcmask 1043456   ;;  %vm218_vm2 = vcmask 64516   ;;  %s358_s1 = inlined_call_operand.vmem [shape: bf16[64,392], index: 1, kind: input, shape index: {}]   ;;  %s359_s2 = inlined_call_operand.vmem [shape: f32[4,1], index: 2, kind: input, shape index: {}]   ;;  %s360_s0 = inlined_call_operand.vmem [shape: bf16[4,64], index: 0, kind: input, shape index: {}]   ;;  %s361_s3 = inlined_call_operand.vmem [shape: f32[4,392], index: 3, kind: output, shape index: {}]  }
   0x1   :  { %v245_v0 = vld [vmem:[%s358_s1 + $0x4] ss:$16 sps:$4 sm:$0xff]   ;;  %154 = vmatprep.mubr.bf16.mxu0 %v277_v1  ;;  %195 = vmatprep.mubr.bf16.mxu1 %v277_v1  ;;  %v247_v2 = vld [vmem:[%s358_s1 + $0xc] ss:$16 sps:$4 sm:$0xff]   ;;  %v249_v3 = vld [vmem:[%s358_s1] ss:$16 sps:$4 sm:$0xff]  }
   0x2   :  { %244 = vset.pattern.permute.xlu0 %v277_v1  ;;  %122 = vmatprep.subr.bf16.mxu0 %v245_v0  ;;  %v250_v4 = vld [vmem:[%s358_s1 + $0x8] ss:$16 sps:$4 sm:$0xff]   ;;  %v251_v5 = vld [vmem:[%s358_s1 + $0x24] ss:$16 sps:$4 sm:$0xff]   ;;  %v253_v6 = vld [vmem:[%s358_s1 + $0x2c] ss:$16 sps:$4 sm:$0xff]  }
   0x3   :  { %163 = vmatprep.subr.bf16.mxu1 %v247_v2  ;;  %123 = vmatpush1.bf16.msra.mxu0 %v249_v3  ;;  %v255_v7 = vld [vmem:[%s358_s1 + $0x20] ss:$16 sps:$4 sm:$0xff]   ;;  %v256_v8 = vld [vmem:[%s358_s1 + $0x28] ss:$16 sps:$4 sm:$0xff]   ;;  %v257_v9 = vld [vmem:[%s358_s1 + $0x44] ss:$16 sps:$4 sm:$0xff]  }
   0x4   :  { %164 = vmatpush1.bf16.msra.mxu1 %v250_v4  ;;  %124 = vmatprep.subr.bf16.mxu0 %v251_v5  ;;  %v259_v10 = vld [vmem:[%s358_s1 + $0x4c] ss:$16 sps:$4 sm:$0xff]   ;;  %v261_v11 = vld [vmem:[%s358_s1 + $0x40] ss:$16 sps:$4 sm:$0xff]   ;;  %v262_v12 = vld [vmem:[%s358_s1 + $0x48] ss:$16 sps:$4 sm:$0xff]  }
   0x5   :  { %165 = vmatprep.subr.bf16.mxu1 %v253_v6  ;;  %v263_v13 = vld [vmem:[%s358_s1 + $0x64] ss:$16 sps:$4 sm:$0xff]   ;;  %v265_v14 = vld [vmem:[%s358_s1 + $0x6c] ss:$16 sps:$4 sm:$0xff]   ;;  %v32_v15 = vld [vmem:[%s359_s2] sm:$0xf] }
   0x6   :  { %v267_v16 = vld [vmem:[%s358_s1 + $0x60] ss:$16 sps:$4 sm:$0xff]   ;;  %v268_v17 = vld [vmem:[%s358_s1 + $0x68] ss:$16 sps:$4 sm:$0xff]   ;;  %35 = vperm.xlu0 %244, %v32_v15   ;;  %vm219_vm3 = vmor %vm218_vm2, %vm217_vm1 }
   0x7   :  { %125 = vmatpush1.bf16.msra.mxu0 %v255_v7  ;;  %v15_v18 = vld [vmem:[%s360_s0] sm:$0x3] }
   0x8   :  { %166 = vmatpush1.bf16.msra.mxu1 %v256_v8  ;;  %126 = vmatprep.subr.bf16.mxu0 %v257_v9 }
   0x9   :  { %167 = vmatprep.subr.bf16.mxu1 %v259_v10 }
   0xb   :  { %127 = vmatpush1.bf16.msra.mxu0 %v261_v11 }
   0xc   :  { %168 = vmatpush1.bf16.msra.mxu1 %v262_v12  ;;  %128 = vmatprep.subr.bf16.mxu0 %v263_v13 }
   0xd   :  { %169 = vmatprep.subr.bf16.mxu1 %v265_v14 }
   0xf   :  { %129 = vmatpush1.bf16.msra.mxu0 %v267_v16 }
  0x10   :  { %170 = vmatpush1.bf16.msra.mxu1 %v268_v17 }
  0x12   :  { %241 = vmatmul.mubr.msk.bf16.vlgmr.msra.gmra.mrb[0].mxu0 %vm118_vm0, %v15_v18 }
  0x13   :  { %242 = vmatmul.mubr.msk.bf16.vlgmr.msra.gmra.mrb[0].mxu1 %vm118_vm0, %v15_v18 }
  0x85   :  { %v36_v19 = vpop.permute.xlu0 %35 }
  0xe5   :  { %v156_v20 = vpop.f32.mrb[0].mxu0 }
  0xe6   :  { %v197_v21 = vpop.f32.mrb[0].mxu1  ;;  %v157_v22 = vadd.f32 %v156_v20, %v36_v19  ;;  %v158_v24 = vpop.f32.mrb[1].mxu0 }
  0xe7   :  { %v198_v23 = vadd.f32 %v197_v21, %v36_v19  ;;  %v199_v25 = vpop.f32.mrb[1].mxu1  ;;  %v159_v26 = vadd.f32 %v158_v24, %v36_v19  ;;  %v160_v28 = vpop.f32.mrb[2].mxu0 }
  0xe8   :  { %v200_v27 = vadd.f32 %v199_v25, %v36_v19  ;;  %v201_v29 = vpop.f32.mrb[2].mxu1  ;;  %269 = vtanh.f32 %v157_v22  ;;  %v161_v30 = vpop.f32.mrb[3].mxu0 }
  0xe9   :  { %v202_v31 = vpop.f32.mrb[3].mxu1  ;;  %271 = vtanh.f32 %v198_v23 }
  0xea   :  { %273 = vtanh.f32 %v159_v26 }
  0xeb   :  { %275 = vtanh.f32 %v200_v27 }
  0xf2   :  { %v270_v32 = vpop.eup %269 }
  0xf3   :  { %v272_v33 = vpop.eup %271 }
  0xf4   :  { %v274_v34 = vpop.eup %273 }
  0xf5   :  { %v276_v35 = vpop.eup %275  ;;  %v212_v36 = vcombine.low %v270_v32, %v274_v34 }
  0xf6   :  { %v213_v37 = vcombine.low %v272_v33, %v276_v35 }
  0xf7   :  { %216 = vst [vmem:[%s361_s3] sm:$0xff] %v212_v36 }
  0xf8   :  { %220 = vst.msk [vmem:[%s361_s3 + $0x8] sm:$0xff] %vm219_vm3, %v213_v37 }

</bundles_post_ra>
